<compile_context>
chip_gen: v5e
topology: v5e:2x2
jax: 0.10.0
libtpu: 0.0.40
codegen_flags: <defaults>
</compile_context>

<pallas_src>
import jax
import jax.numpy as jnp
from jax.experimental import pallas as pl
from jax.experimental.pallas import tpu as pltpu

B = 2                # molecules
A = 8                # atoms per molecule
N_NBH = A - 1        # neighbors per atom (all other atoms)
N_IN = 128           # representation width
H = N_IN // 2        # pyramidal hidden width (n_layers=2)
N_OUT = 2            # Polarizability MLP output channels per atom
BA = B * A           # 16
BAN = B * A * N_NBH  # 112

OUT_ROWS = 8         # sublane-padded output rows (>= B)
OUT_LANES = 128      # lane-dense packed output slab width

_LOG2 = 0.6931471805599453


def _ssp(z):
    # shifted_softplus(z) = softplus(z) - ln 2, one exp + one log (stable form)
    return jnp.maximum(z, 0.0) + jnp.log(1.0 + jnp.exp(-jnp.abs(z))) - _LOG2


def polarizability_kernel(
    x_ref,          # [BA, N_IN]  representation, flattened over (batch, atoms)
    pos_ref,        # [BA, 3]     positions
    gmat_ref,       # [BAN, BA]   one-hot neighbor gather matrix
    dmat_ref,       # [BAN, BA]   (neighbor - center) one-hot difference matrix
    sum_nbh_ref,    # [BA, BAN]   per-atom neighbor segment-sum matrix (nbh_mask folded in)
    sum_mol_ref,    # [B, BA]     per-molecule atom segment-sum matrix (atom_mask folded in)
    nbh_mask_ref,   # [BAN, 1]    only used for the 1/d^3 divide-by-zero guard
    w1_ref,         # [N_IN, H]
    b1_ref,         # [1, H]
    w2_ref,         # [N_OUT, H]  second layer weights (transposed)
    b2_ref,         # [N_OUT]     SMEM scalars
    out_ref,        # [OUT_ROWS, OUT_LANES] packed: row b -> lanes 0:9 polar, lane 9 iso
):
    f32 = jnp.float32
    x = x_ref[...]
    pos = pos_ref[...]
    nbh_mask = nbh_mask_ref[...]

    # ---- atomwise MLP, whole batch fused into one [BA, N_IN] x [N_IN, H] MXU pass ----
    h = _ssp(jnp.dot(x, w1_ref[...], preferred_element_type=f32) + b1_ref[...])   # [BA, H]
    # narrow H -> 2 output layer on the VPU (mul) + XLU (lane reduce), not the MXU
    c1 = jnp.sum(h * w2_ref[0:1, :], axis=-1, keepdims=True) + b2_ref[0]           # [BA, 1]
    c2 = jnp.sum(h * w2_ref[1:2, :], axis=-1, keepdims=True) + b2_ref[1]           # [BA, 1]
    contrib = jnp.concatenate([c1, c2], axis=1)                                     # [BA, 2]

    # ---- neighbor gathers as one-hot matmuls (exact, MXU-friendly) ----
    nbh_contrib = jnp.dot(gmat_ref[...], contrib, preferred_element_type=f32)       # [BAN, 2]
    dist_vec = jnp.dot(dmat_ref[...], pos, preferred_element_type=f32)              # [BAN, 3]
    nc1 = nbh_contrib[:, 0:1]
    nc2 = nbh_contrib[:, 1:2]

    dist = jnp.sqrt(jnp.sum(dist_vec * dist_vec, axis=-1, keepdims=True))           # [BAN, 1]
    # guard the 1/d^3 against masked (possibly zero-distance) neighbor slots
    masked_dist = dist * dist * dist * nbh_mask + (1.0 - nbh_mask)                  # [BAN, 1]

    dip_terms = dist_vec * nc1                                                       # [BAN, 3]
    field_terms = dist_vec * (nc2 / masked_dist)                                     # [BAN, 3]

    # per-atom neighbor sums as one masked segment-sum matmul (mask folded into sum_nbh)
    per_atom = jnp.dot(
        sum_nbh_ref[...],
        jnp.concatenate([dip_terms, field_terms], axis=1),
        preferred_element_type=f32,
    )                                                                                # [BA, 6]
    atomic_dipoles = per_atom[:, 0:3]
    atomic_fields = per_atom[:, 3:6]

    fnorm = jnp.sqrt(jnp.sum(atomic_fields * atomic_fields, axis=-1, keepdims=True))
    fnorm = fnorm + (fnorm < 1e-10).astype(f32)
    atomic_fields = atomic_fields / fnorm

    # symmetric outer product, laid out lane-dense as 9 columns (row-major 3x3):
    #   P[:, 3a+b] = 0.5 * (d_a * f_b + f_a * d_b), built as 3 width-3 lane groups
    rows = []
    for a in range(3):
        rows.append(0.5 * (atomic_dipoles[:, a:a + 1] * atomic_fields
                           + atomic_fields[:, a:a + 1] * atomic_dipoles))
    atomic_polar = jnp.concatenate(rows, axis=1)                                     # [BA, 9]

    # per-molecule masked atom sum via matmul (atom_mask folded into sum_mol)
    global_polar = jnp.dot(sum_mol_ref[...], atomic_polar,
                           preferred_element_type=f32)                               # [B, 9]
    iso = (global_polar[:, 0:1] + global_polar[:, 4:5] + global_polar[:, 8:9]) / 3.0  # [B, 1]

    packed = jnp.concatenate([global_polar, iso], axis=1)                            # [B, 10]
    out_ref[...] = jnp.zeros_like(out_ref)
    out_ref[0:B, 0:10] = packed


def polarizability_forward(inputs, params):
    """Runs the Pallas kernel once for the whole batch; returns {'y', 'y_iso'}."""
    x = inputs["representation"].reshape(BA, N_IN)
    pos = inputs["positions"].reshape(BA, 3)
    neighbors = inputs["neighbors"]                       # [B, A, N] int32
    nbh_mask = inputs["neighbor_mask"].reshape(BAN, 1)
    atom_mask = inputs["atom_mask"].reshape(BA)

    # Index bookkeeping (pure function of the integer neighbor list / masks): one-hot
    # gather, (neighbor - center) difference, and masked segment-sum matrices used as
    # matmuls in-kernel.
    nbr_global = (neighbors
                  + jnp.arange(B, dtype=jnp.int32)[:, None, None] * A).reshape(BAN)
    gmat = jax.nn.one_hot(nbr_global, BA, dtype=jnp.float32)                         # [BAN, BA]
    cmat = jax.nn.one_hot(jnp.repeat(jnp.arange(BA, dtype=jnp.int32), N_NBH),
                          BA, dtype=jnp.float32)                                     # [BAN, BA]
    dmat = gmat - cmat
    sum_nbh = (jnp.arange(BAN)[None, :] // N_NBH
               == jnp.arange(BA)[:, None]).astype(jnp.float32)                       # [BA, BAN]
    sum_nbh = sum_nbh * nbh_mask.reshape(1, BAN)        # fold neighbor mask into segment sum
    sum_mol = (jnp.arange(BA)[None, :] // A
               == jnp.arange(B)[:, None]).astype(jnp.float32)                        # [B, BA]
    sum_mol = sum_mol * atom_mask[None, :]              # fold atom mask into molecule sum

    vmem = lambda shape: pl.BlockSpec(shape, lambda i: (0,) * len(shape))

    out = pl.pallas_call(
        polarizability_kernel,
        grid=(1,),
        in_specs=[
            vmem((BA, N_IN)), vmem((BA, 3)),
            vmem((BAN, BA)), vmem((BAN, BA)),
            vmem((BA, BAN)), vmem((B, BA)),
            vmem((BAN, 1)),
            vmem((N_IN, H)), vmem((1, H)), vmem((N_OUT, H)),
            pl.BlockSpec(memory_space=pltpu.MemorySpace.SMEM),      # b2 scalars
        ],
        out_specs=pl.BlockSpec((OUT_ROWS, OUT_LANES), lambda i: (0, 0)),
        out_shape=jax.ShapeDtypeStruct((OUT_ROWS, OUT_LANES), jnp.float32),
        compiler_params=pltpu.CompilerParams(dimension_semantics=("arbitrary",)),
    )(x, pos, gmat, dmat, sum_nbh, sum_mol, nbh_mask,
      params["w1"], params["b1"], params["w2"], params["b2"])

    y = out[:B, 0:9].reshape(B, 3, 3)
    y_iso = out[:B, 9:10]
    return {"y": y, "y_iso": y_iso}


def _reference_forward(inputs, params):
    """Pure-JAX reference of the Polarizability forward pass (for verification)."""
    x = inputs["representation"]
    pos = inputs["positions"]
    nbr = inputs["neighbors"]
    nbh_mask = inputs["neighbor_mask"]
    atom_mask = inputs["atom_mask"]
    bidx = jnp.arange(B)[:, None, None]

    gathered_pos = pos[bidx, nbr]                                   # [B,A,N,3]
    dist_vec = gathered_pos - pos[:, :, None, :]
    distances = jnp.sqrt(jnp.sum(dist_vec ** 2, axis=-1))           # [B,A,N]

    h = _ssp(x @ params["w1"] + params["b1"])
    contrib = h @ params["w2"].T + params["b2"]                     # [B,A,2]
    nbh_contrib = contrib[bidx, nbr]                                # [B,A,N,2]
    nc1 = nbh_contrib[..., 0]
    nc2 = nbh_contrib[..., 1]

    atomic_dipoles = jnp.sum(dist_vec * nc1[..., None] * nbh_mask[..., None], axis=2)
    masked_dist = distances ** 3 * nbh_mask + (1.0 - nbh_mask)
    nbh_fields = dist_vec * nc2[..., None] / masked_dist[..., None]
    atomic_fields = jnp.sum(nbh_fields * nbh_mask[..., None], axis=2)
    fnorm = jnp.sqrt(jnp.sum(atomic_fields ** 2, axis=-1, keepdims=True))
    fnorm = fnorm + (fnorm < 1e-10).astype(jnp.float32)
    atomic_fields = atomic_fields / fnorm

    atomic_polar = atomic_dipoles[..., :, None] * atomic_fields[..., None, :]
    atomic_polar = 0.5 * (atomic_polar + jnp.swapaxes(atomic_polar, -1, -2))
    global_polar = jnp.sum(atomic_polar * atom_mask[..., None, None], axis=1)   # [B,3,3]
    y_iso = jnp.mean(jnp.diagonal(global_polar, axis1=-2, axis2=-1),
                     axis=-1, keepdims=True)
    return {"y": global_polar, "y_iso": y_iso}


def _make_params(key):
    k1, k2, k3, k4 = jax.random.split(key, 4)
    return {
        "w1": jax.random.normal(k1, (N_IN, H), jnp.float32) / jnp.sqrt(N_IN),
        "b1": 0.1 * jax.random.normal(k2, (1, H), jnp.float32),
        "w2": jax.random.normal(k3, (N_OUT, H), jnp.float32) / jnp.sqrt(H),  # transposed [2,H]
        "b2": 0.05 * jax.random.normal(k4, (N_OUT,), jnp.float32),
    }


if __name__ == "__main__":
    key = jax.random.PRNGKey(0)
    k_rep, k_pos, k_par = jax.random.split(key, 3)

    representation = jax.random.normal(k_rep, (B, A, N_IN), jnp.float32)

    # atoms near cube corners (keeps pair distances >= ~1 so 1/d^3 is well conditioned)
    base = jnp.array([[(i >> 0) & 1, (i >> 1) & 1, (i >> 2) & 1] for i in range(A)],
                     jnp.float32) * 1.5
    positions = base[None, :, :] + 0.1 * jax.random.normal(k_pos, (B, A, 3), jnp.float32)

    # full neighbor list: every other atom in the molecule
    nbr_list = [[j for j in range(A) if j != i] for i in range(A)]
    neighbors = jnp.broadcast_to(jnp.array(nbr_list, jnp.int32), (B, A, N_NBH))

    # molecule 0: 8 real atoms; molecule 1: 6 real + 2 padded
    atom_mask = jnp.array([[1.0] * 8, [1.0] * 6 + [0.0] * 2], jnp.float32)
    bidx = jnp.arange(B)[:, None, None]
    neighbor_mask = atom_mask[:, :, None] * atom_mask[bidx, neighbors]

    inputs = {
        "representation": representation,
        "positions": positions,
        "neighbors": neighbors,
        "neighbor_mask": neighbor_mask,
        "atom_mask": atom_mask,
    }
    params = _make_params(k_par)

    outs = polarizability_forward(inputs, params)
    jax.block_until_ready(outs)

    ref = _reference_forward(inputs, params)
    assert jnp.allclose(outs["y"], ref["y"], atol=1e-3, rtol=1e-3), "polarizability mismatch"
    assert jnp.allclose(outs["y_iso"], ref["y_iso"], atol=1e-3, rtol=1e-3), "isotropic mismatch"

    print("KERNEL_OK")
</pallas_src>

<mosaic_0001>
module attributes {stable_mosaic.version = 11 : i64} {
  func.func @polarizability_kernel(%arg0: i32, %arg1: memref<16x128xf32, #tpu.memory_space<vmem>>, %arg2: memref<16x3xf32, #tpu.memory_space<vmem>>, %arg3: memref<112x16xf32, #tpu.memory_space<vmem>>, %arg4: memref<112x16xf32, #tpu.memory_space<vmem>>, %arg5: memref<16x112xf32, #tpu.memory_space<vmem>>, %arg6: memref<2x16xf32, #tpu.memory_space<vmem>>, %arg7: memref<112x1xf32, #tpu.memory_space<vmem>>, %arg8: memref<128x64xf32, #tpu.memory_space<vmem>>, %arg9: memref<1x64xf32, #tpu.memory_space<vmem>>, %arg10: memref<2x64xf32, #tpu.memory_space<vmem>>, %arg11: memref<2xf32, #tpu.memory_space<smem>>, %arg12: memref<8x128xf32, #tpu.memory_space<vmem>>) attributes {dimension_semantics = [#tpu.dimension_semantics<arbitrary>], iteration_bounds = array<i64: 1>, scalar_prefetch = 0 : i64, scratch_operands = 0 : i64, tpu.core_type = #tpu.core_type<tc>, window_params = [{pipeline_mode = #tpu.pipeline_mode<synchronous>, transform_indices = @transform_0, window_bounds = array<i64: 16, 128>}, {pipeline_mode = #tpu.pipeline_mode<synchronous>, transform_indices = @transform_1, window_bounds = array<i64: 16, 3>}, {pipeline_mode = #tpu.pipeline_mode<synchronous>, transform_indices = @transform_2, window_bounds = array<i64: 112, 16>}, {pipeline_mode = #tpu.pipeline_mode<synchronous>, transform_indices = @transform_3, window_bounds = array<i64: 112, 16>}, {pipeline_mode = #tpu.pipeline_mode<synchronous>, transform_indices = @transform_4, window_bounds = array<i64: 16, 112>}, {pipeline_mode = #tpu.pipeline_mode<synchronous>, transform_indices = @transform_5, window_bounds = array<i64: 2, 16>}, {pipeline_mode = #tpu.pipeline_mode<synchronous>, transform_indices = @transform_6, window_bounds = array<i64: 112, 1>}, {pipeline_mode = #tpu.pipeline_mode<synchronous>, transform_indices = @transform_7, window_bounds = array<i64: 128, 64>}, {pipeline_mode = #tpu.pipeline_mode<synchronous>, transform_indices = @transform_8, window_bounds = array<i64: 1, 64>}, {pipeline_mode = #tpu.pipeline_mode<synchronous>, transform_indices = @transform_9, window_bounds = array<i64: 2, 64>}, {transform_indices = @transform_10, window_bounds = array<i64: 2>}, {pipeline_mode = #tpu.pipeline_mode<synchronous>, transform_indices = @transform_11, window_bounds = array<i64: 8, 128>}]} {
    %c0 = arith.constant 0 : index
    %c0_0 = arith.constant 0 : index
    %0 = vector.load %arg1[%c0, %c0_0] : memref<16x128xf32, #tpu.memory_space<vmem>>, vector<16x128xf32>
    %c0_1 = arith.constant 0 : index
    %c0_2 = arith.constant 0 : index
    %1 = vector.load %arg2[%c0_1, %c0_2] : memref<16x3xf32, #tpu.memory_space<vmem>>, vector<16x3xf32>
    %c0_3 = arith.constant 0 : index
    %c0_4 = arith.constant 0 : index
    %2 = vector.load %arg7[%c0_3, %c0_4] : memref<112x1xf32, #tpu.memory_space<vmem>>, vector<112x1xf32>
    %c0_5 = arith.constant 0 : index
    %c0_6 = arith.constant 0 : index
    %3 = vector.load %arg8[%c0_5, %c0_6] : memref<128x64xf32, #tpu.memory_space<vmem>>, vector<128x64xf32>
    %cst = arith.constant dense<0.000000e+00> : vector<16x64xf32>
    %4 = tpu.matmul %0, %3, %cst {dimension_numbers = #tpu.dot_dimension_numbers<[1], [0], [0], [1], [0, 0, 1, 1], [], []>} : vector<16x128xf32>, vector<128x64xf32>, vector<16x64xf32> -> vector<16x64xf32>
    %c0_7 = arith.constant 0 : index
    %c0_8 = arith.constant 0 : index
    %5 = vector.load %arg9[%c0_7, %c0_8] : memref<1x64xf32, #tpu.memory_space<vmem>>, vector<1x64xf32>
    %6 = vector.broadcast %5 : vector<1x64xf32> to vector<16x64xf32>
    %7 = arith.addf %4, %6 : vector<16x64xf32>
    %cst_9 = arith.constant 0.000000e+00 : f32
    %8 = vector.broadcast %cst_9 : f32 to vector<16x64xf32>
    %9 = arith.maximumf %7, %8 : vector<16x64xf32>
    %10 = math.absf %7 : vector<16x64xf32>
    %cst_10 = arith.constant 0.000000e+00 : f32
    %11 = vector.broadcast %cst_10 : f32 to vector<16x64xf32>
    %12 = arith.subf %11, %10 : vector<16x64xf32>
    %13 = math.exp %12 : vector<16x64xf32>
    %cst_11 = arith.constant 1.000000e+00 : f32
    %14 = vector.broadcast %cst_11 : f32 to vector<16x64xf32>
    %15 = arith.addf %14, %13 : vector<16x64xf32>
    %16 = math.log %15 : vector<16x64xf32>
    %17 = arith.addf %9, %16 : vector<16x64xf32>
    %cst_12 = arith.constant 0.693147182 : f32
    %18 = vector.broadcast %cst_12 : f32 to vector<16x64xf32>
    %19 = arith.subf %17, %18 : vector<16x64xf32>
    %c0_13 = arith.constant 0 : index
    %c0_14 = arith.constant 0 : index
    %20 = vector.load %arg10[%c0_13, %c0_14] : memref<2x64xf32, #tpu.memory_space<vmem>>, vector<1x64xf32>
    %21 = vector.broadcast %20 : vector<1x64xf32> to vector<16x64xf32>
    %22 = arith.mulf %19, %21 : vector<16x64xf32>
    %cst_15 = arith.constant dense<0.000000e+00> : vector<16xf32>
    %23 = vector.multi_reduction <add>, %22, %cst_15 [1] : vector<16x64xf32> to vector<16xf32>
    %24 = vector.shape_cast %23 : vector<16xf32> to vector<16x1xf32>
    %c0_16 = arith.constant 0 : index
    %25 = memref.load %arg11[%c0_16] : memref<2xf32, #tpu.memory_space<smem>>
    %26 = vector.broadcast %25 : f32 to vector<16x1xf32>
    %27 = arith.addf %24, %26 : vector<16x1xf32>
    %c1 = arith.constant 1 : index
    %c0_17 = arith.constant 0 : index
    %28 = vector.load %arg10[%c1, %c0_17] : memref<2x64xf32, #tpu.memory_space<vmem>>, vector<1x64xf32>
    %29 = vector.broadcast %28 : vector<1x64xf32> to vector<16x64xf32>
    %30 = arith.mulf %19, %29 : vector<16x64xf32>
    %cst_18 = arith.constant dense<0.000000e+00> : vector<16xf32>
    %31 = vector.multi_reduction <add>, %30, %cst_18 [1] : vector<16x64xf32> to vector<16xf32>
    %32 = vector.shape_cast %31 : vector<16xf32> to vector<16x1xf32>
    %c1_19 = arith.constant 1 : index
    %33 = memref.load %arg11[%c1_19] : memref<2xf32, #tpu.memory_space<smem>>
    %34 = vector.broadcast %33 : f32 to vector<16x1xf32>
    %35 = arith.addf %32, %34 : vector<16x1xf32>
    %36 = tpu.concatenate %27, %35 in 1 : vector<16x1xf32>, vector<16x1xf32> -> vector<16x2xf32>
    %c0_20 = arith.constant 0 : index
    %c0_21 = arith.constant 0 : index
    %37 = vector.load %arg3[%c0_20, %c0_21] : memref<112x16xf32, #tpu.memory_space<vmem>>, vector<112x16xf32>
    %cst_22 = arith.constant dense<0.000000e+00> : vector<112x2xf32>
    %38 = tpu.matmul %37, %36, %cst_22 {dimension_numbers = #tpu.dot_dimension_numbers<[1], [0], [0], [1], [0, 0, 1, 1], [], []>} : vector<112x16xf32>, vector<16x2xf32>, vector<112x2xf32> -> vector<112x2xf32>
    %c0_23 = arith.constant 0 : index
    %c0_24 = arith.constant 0 : index
    %39 = vector.load %arg4[%c0_23, %c0_24] : memref<112x16xf32, #tpu.memory_space<vmem>>, vector<112x16xf32>
    %cst_25 = arith.constant dense<0.000000e+00> : vector<112x3xf32>
    %40 = tpu.matmul %39, %1, %cst_25 {dimension_numbers = #tpu.dot_dimension_numbers<[1], [0], [0], [1], [0, 0, 1, 1], [], []>} : vector<112x16xf32>, vector<16x3xf32>, vector<112x3xf32> -> vector<112x3xf32>
    %41 = vector.extract_strided_slice %38 {offsets = [0, 0], sizes = [112, 1], strides = [1, 1]} : vector<112x2xf32> to vector<112x1xf32>
    %42 = vector.extract_strided_slice %38 {offsets = [0, 1], sizes = [112, 1], strides = [1, 1]} : vector<112x2xf32> to vector<112x1xf32>
    %43 = arith.mulf %40, %40 : vector<112x3xf32>
    %cst_26 = arith.constant dense<0.000000e+00> : vector<112xf32>
    %44 = vector.multi_reduction <add>, %43, %cst_26 [1] : vector<112x3xf32> to vector<112xf32>
    %45 = vector.shape_cast %44 : vector<112xf32> to vector<112x1xf32>
    %46 = math.sqrt %45 : vector<112x1xf32>
    %47 = arith.mulf %46, %46 : vector<112x1xf32>
    %48 = arith.mulf %47, %46 : vector<112x1xf32>
    %49 = arith.mulf %48, %2 : vector<112x1xf32>
    %cst_27 = arith.constant 1.000000e+00 : f32
    %50 = vector.broadcast %cst_27 : f32 to vector<112x1xf32>
    %51 = arith.subf %50, %2 : vector<112x1xf32>
    %52 = arith.addf %49, %51 : vector<112x1xf32>
    %53 = vector.broadcast %41 : vector<112x1xf32> to vector<112x3xf32>
    %54 = arith.mulf %40, %53 : vector<112x3xf32>
    %55 = arith.divf %42, %52 : vector<112x1xf32>
    %56 = vector.broadcast %55 : vector<112x1xf32> to vector<112x3xf32>
    %57 = arith.mulf %40, %56 : vector<112x3xf32>
    %c0_28 = arith.constant 0 : index
    %c0_29 = arith.constant 0 : index
    %58 = vector.load %arg5[%c0_28, %c0_29] : memref<16x112xf32, #tpu.memory_space<vmem>>, vector<16x112xf32>
    %59 = tpu.concatenate %54, %57 in 1 : vector<112x3xf32>, vector<112x3xf32> -> vector<112x6xf32>
    %cst_30 = arith.constant dense<0.000000e+00> : vector<16x6xf32>
    %60 = tpu.matmul %58, %59, %cst_30 {dimension_numbers = #tpu.dot_dimension_numbers<[1], [0], [0], [1], [0, 0, 1, 1], [], []>} : vector<16x112xf32>, vector<112x6xf32>, vector<16x6xf32> -> vector<16x6xf32>
    %61 = vector.extract_strided_slice %60 {offsets = [0, 0], sizes = [16, 3], strides = [1, 1]} : vector<16x6xf32> to vector<16x3xf32>
    %62 = vector.extract_strided_slice %60 {offsets = [0, 3], sizes = [16, 3], strides = [1, 1]} : vector<16x6xf32> to vector<16x3xf32>
    %63 = arith.mulf %62, %62 : vector<16x3xf32>
    %cst_31 = arith.constant dense<0.000000e+00> : vector<16xf32>
    %64 = vector.multi_reduction <add>, %63, %cst_31 [1] : vector<16x3xf32> to vector<16xf32>
    %65 = vector.shape_cast %64 : vector<16xf32> to vector<16x1xf32>
    %66 = math.sqrt %65 : vector<16x1xf32>
    %cst_32 = arith.constant 1.000000e-10 : f32
    %67 = vector.broadcast %cst_32 : f32 to vector<16x1xf32>
    %68 = arith.cmpf olt, %66, %67 : vector<16x1xf32>
    %69 = arith.extui %68 : vector<16x1xi1> to vector<16x1xi32>
    %70 = arith.sitofp %69 : vector<16x1xi32> to vector<16x1xf32>
    %71 = arith.addf %66, %70 : vector<16x1xf32>
    %72 = vector.broadcast %71 : vector<16x1xf32> to vector<16x3xf32>
    %73 = arith.divf %62, %72 : vector<16x3xf32>
    %74 = vector.extract_strided_slice %61 {offsets = [0, 0], sizes = [16, 1], strides = [1, 1]} : vector<16x3xf32> to vector<16x1xf32>
    %75 = vector.broadcast %74 : vector<16x1xf32> to vector<16x3xf32>
    %76 = arith.mulf %75, %73 : vector<16x3xf32>
    %77 = vector.extract_strided_slice %73 {offsets = [0, 0], sizes = [16, 1], strides = [1, 1]} : vector<16x3xf32> to vector<16x1xf32>
    %78 = vector.broadcast %77 : vector<16x1xf32> to vector<16x3xf32>
    %79 = arith.mulf %78, %61 : vector<16x3xf32>
    %80 = arith.addf %76, %79 : vector<16x3xf32>
    %cst_33 = arith.constant 5.000000e-01 : f32
    %81 = vector.broadcast %cst_33 : f32 to vector<16x3xf32>
    %82 = arith.mulf %81, %80 : vector<16x3xf32>
    %83 = vector.extract_strided_slice %61 {offsets = [0, 1], sizes = [16, 1], strides = [1, 1]} : vector<16x3xf32> to vector<16x1xf32>
    %84 = vector.broadcast %83 : vector<16x1xf32> to vector<16x3xf32>
    %85 = arith.mulf %84, %73 : vector<16x3xf32>
    %86 = vector.extract_strided_slice %73 {offsets = [0, 1], sizes = [16, 1], strides = [1, 1]} : vector<16x3xf32> to vector<16x1xf32>
    %87 = vector.broadcast %86 : vector<16x1xf32> to vector<16x3xf32>
    %88 = arith.mulf %87, %61 : vector<16x3xf32>
    %89 = arith.addf %85, %88 : vector<16x3xf32>
    %cst_34 = arith.constant 5.000000e-01 : f32
    %90 = vector.broadcast %cst_34 : f32 to vector<16x3xf32>
    %91 = arith.mulf %90, %89 : vector<16x3xf32>
    %92 = vector.extract_strided_slice %61 {offsets = [0, 2], sizes = [16, 1], strides = [1, 1]} : vector<16x3xf32> to vector<16x1xf32>
    %93 = vector.broadcast %92 : vector<16x1xf32> to vector<16x3xf32>
    %94 = arith.mulf %93, %73 : vector<16x3xf32>
    %95 = vector.extract_strided_slice %73 {offsets = [0, 2], sizes = [16, 1], strides = [1, 1]} : vector<16x3xf32> to vector<16x1xf32>
    %96 = vector.broadcast %95 : vector<16x1xf32> to vector<16x3xf32>
    %97 = arith.mulf %96, %61 : vector<16x3xf32>
    %98 = arith.addf %94, %97 : vector<16x3xf32>
    %cst_35 = arith.constant 5.000000e-01 : f32
    %99 = vector.broadcast %cst_35 : f32 to vector<16x3xf32>
    %100 = arith.mulf %99, %98 : vector<16x3xf32>
    %101 = tpu.concatenate %82, %91, %100 in 1 : vector<16x3xf32>, vector<16x3xf32>, vector<16x3xf32> -> vector<16x9xf32>
    %c0_36 = arith.constant 0 : index
    %c0_37 = arith.constant 0 : index
    %102 = vector.load %arg6[%c0_36, %c0_37] : memref<2x16xf32, #tpu.memory_space<vmem>>, vector<2x16xf32>
    %cst_38 = arith.constant dense<0.000000e+00> : vector<2x9xf32>
    %103 = tpu.matmul %102, %101, %cst_38 {dimension_numbers = #tpu.dot_dimension_numbers<[1], [0], [0], [1], [0, 0, 1, 1], [], []>} : vector<2x16xf32>, vector<16x9xf32>, vector<2x9xf32> -> vector<2x9xf32>
    %104 = vector.extract_strided_slice %103 {offsets = [0, 0], sizes = [2, 1], strides = [1, 1]} : vector<2x9xf32> to vector<2x1xf32>
    %105 = vector.extract_strided_slice %103 {offsets = [0, 4], sizes = [2, 1], strides = [1, 1]} : vector<2x9xf32> to vector<2x1xf32>
    %106 = arith.addf %104, %105 : vector<2x1xf32>
    %107 = vector.extract_strided_slice %103 {offsets = [0, 8], sizes = [2, 1], strides = [1, 1]} : vector<2x9xf32> to vector<2x1xf32>
    %108 = arith.addf %106, %107 : vector<2x1xf32>
    %cst_39 = arith.constant 3.000000e+00 : f32
    %109 = vector.broadcast %cst_39 : f32 to vector<2x1xf32>
    %110 = arith.divf %108, %109 : vector<2x1xf32>
    %111 = tpu.concatenate %103, %110 in 1 : vector<2x9xf32>, vector<2x1xf32> -> vector<2x10xf32>
    %cst_40 = arith.constant 0.000000e+00 : f32
    %112 = vector.broadcast %cst_40 : f32 to vector<8x128xf32>
    %c0_41 = arith.constant 0 : index
    %c0_42 = arith.constant 0 : index
    %113 = vector.load %arg12[%c0_41, %c0_42] : memref<8x128xf32, #tpu.memory_space<vmem>>, vector<8x128xf32>
    tpu.vector_store %arg12[%c0_41, %c0_42], %112 {strides = array<i32>} : memref<8x128xf32, #tpu.memory_space<vmem>>, vector<8x128xf32>,
    %c0_43 = arith.constant 0 : index
    %c0_44 = arith.constant 0 : index
    %114 = vector.load %arg12[%c0_43, %c0_44] : memref<8x128xf32, #tpu.memory_space<vmem>>, vector<2x10xf32>
    tpu.vector_store %arg12[%c0_43, %c0_44], %111 {strides = array<i32>} : memref<8x128xf32, #tpu.memory_space<vmem>>, vector<2x10xf32>,
    return
  }
  func.func @transform_0(%arg0: i32) -> (i32, i32) {
    %c0_i32 = arith.constant 0 : i32
    %c0_i32_0 = arith.constant 0 : i32
    %c0_i32_1 = arith.constant 0 : i32
    return %c0_i32, %c0_i32_0 : i32, i32
  }
  func.func @transform_1(%arg0: i32) -> (i32, i32) {
    %c0_i32 = arith.constant 0 : i32
    %c0_i32_0 = arith.constant 0 : i32
    %c0_i32_1 = arith.constant 0 : i32
    return %c0_i32, %c0_i32_0 : i32, i32
  }
  func.func @transform_2(%arg0: i32) -> (i32, i32) {
    %c0_i32 = arith.constant 0 : i32
    %c0_i32_0 = arith.constant 0 : i32
    %c0_i32_1 = arith.constant 0 : i32
    return %c0_i32, %c0_i32_0 : i32, i32
  }
  func.func @transform_3(%arg0: i32) -> (i32, i32) {
    %c0_i32 = arith.constant 0 : i32
    %c0_i32_0 = arith.constant 0 : i32
    %c0_i32_1 = arith.constant 0 : i32
    return %c0_i32, %c0_i32_0 : i32, i32
  }
  func.func @transform_4(%arg0: i32) -> (i32, i32) {
    %c0_i32 = arith.constant 0 : i32
    %c0_i32_0 = arith.constant 0 : i32
    %c0_i32_1 = arith.constant 0 : i32
    return %c0_i32, %c0_i32_0 : i32, i32
  }
  func.func @transform_5(%arg0: i32) -> (i32, i32) {
    %c0_i32 = arith.constant 0 : i32
    %c0_i32_0 = arith.constant 0 : i32
    %c0_i32_1 = arith.constant 0 : i32
    return %c0_i32, %c0_i32_0 : i32, i32
  }
  func.func @transform_6(%arg0: i32) -> (i32, i32) {
    %c0_i32 = arith.constant 0 : i32
    %c0_i32_0 = arith.constant 0 : i32
    %c0_i32_1 = arith.constant 0 : i32
    return %c0_i32, %c0_i32_0 : i32, i32
  }
  func.func @transform_7(%arg0: i32) -> (i32, i32) {
    %c0_i32 = arith.constant 0 : i32
    %c0_i32_0 = arith.constant 0 : i32
    %c0_i32_1 = arith.constant 0 : i32
    return %c0_i32, %c0_i32_0 : i32, i32
  }
  func.func @transform_8(%arg0: i32) -> (i32, i32) {
    %c0_i32 = arith.constant 0 : i32
    %c0_i32_0 = arith.constant 0 : i32
    %c0_i32_1 = arith.constant 0 : i32
    return %c0_i32, %c0_i32_0 : i32, i32
  }
  func.func @transform_9(%arg0: i32) -> (i32, i32) {
    %c0_i32 = arith.constant 0 : i32
    %c0_i32_0 = arith.constant 0 : i32
    %c0_i32_1 = arith.constant 0 : i32
    return %c0_i32, %c0_i32_0 : i32, i32
  }
  func.func @transform_10(%arg0: i32) -> i32 {
    %c0_i32 = arith.constant 0 : i32
    %c0_i32_0 = arith.constant 0 : i32
    return %c0_i32 : i32
  }
  func.func @transform_11(%arg0: i32) -> (i32, i32) {
    %c0_i32 = arith.constant 0 : i32
    %c0_i32_0 = arith.constant 0 : i32
    %c0_i32_1 = arith.constant 0 : i32
    return %c0_i32, %c0_i32_0 : i32, i32
  }
}

</mosaic_0001>

<bundles_post_ra>
// kernel: tpu_custom_call.1
= control target key start
LH: loop header
LB: loop body
LE: loop exit
PB: predicated region body
PF: predicated region fallthrough
CT: control target
= control target key end

     0   :  { %16 = vsyncpa [#allocation4], 0  ;;  %s2718_s0 = inlined_call_operand.vmem [shape: f32[16,128], index: 0, kind: input, shape index: {}]   ;;  %s2719_s1 = inlined_call_operand.vmem [shape: f32[16,3], index: 1, kind: input, shape index: {}]   ;;  %s2720_s2 = inlined_call_operand.vmem [shape: f32[112,16], index: 2, kind: input, shape index: {}]   ;;  %s2721_s3 = inlined_call_operand.vmem [shape: f32[112,16], index: 3, kind: input, shape index: {}]   ;;  %s2722_s4 = inlined_call_operand.vmem [shape: f32[16,112], index: 4, kind: input, shape index: {}]   ;;  %s2723_s5 = inlined_call_operand.vmem [shape: f32[2,16], index: 5, kind: input, shape index: {}]   ;;  %s2724_s6 = inlined_call_operand.vmem [shape: f32[112,1], index: 6, kind: input, shape index: {}]   ;;  %s2725_s7 = inlined_call_operand.vmem [shape: f32[128,64], index: 7, kind: input, shape index: {}]   ;;  %s2726_s8 = inlined_call_operand.vmem [shape: f32[1,64], index: 8, kind: input, shape index: {}]   ;;  %s2727_s9 = inlined_call_operand.vmem [shape: f32[2,64], index: 9, kind: input, shape index: {}]   ;;  %s2728_s10 = inlined_call_operand.vmem [shape: f32[2], index: 10, kind: input, shape index: {}]   ;;  %s2729_s11 = inlined_call_operand.hbm [shape: f32[8,128], index: 11, kind: output, shape index: {}]  }
   0x1   :  { %17 = vsyncpa [#allocation3], 0  ;;  %s43_s19 = sshll.u32 %s2728_s10, 4  ;;  %s1729_s20 = smov [#allocation2]   ;;  %s44_s19 = int_to_ptr.vmem [resolvable:$true] %s43_s19 }
   0x2   :  { %46 = dma.vmem_to_smem %s44_s19, 16, %s1729_s20, [#allocation4]  }
   0x3   :  { %1725 = dma.done.wait [#allocation4], 16  }
   0x4   :  { %1726 = vsyncadd [#allocation4], 4294967280 }
   0x5   :  { %51 = sfence }
   0x6   :  { %v85_v0 = vld [vmem:[%s2725_s7 + $0x78] sm:$0xff]  ;;  %v55_v1 = vld [vmem:[%s2719_s1 + $0x8] sm:$0xff]  ;;  %v84_v2 = vld [vmem:[%s2725_s7 + $0x70] sm:$0xff]  ;;  %vm179_vm0 = vcmask 130048   ;;  %vm410_vm1 = vcmask 23552   ;;  %vm137_vm2 = vcmask 523264  }
   0x7   :  { %90 = vmatpush.msra.mxu0 %v85_v0  ;;  %351 = vmatpush.msra.mxu2 %v55_v1  ;;  %v54_v3 = vld [vmem:[%s2719_s1] sm:$0xff]  ;;  %v83_v5 = vld [vmem:[%s2725_s7 + $0x68] sm:$0xff]  ;;  %v291_v6 = vld [vmem:[%s2721_s3 + $0x50] sm:$0xff]  ;;  %s1495_s28 = sld [smem:[#allocation2 + $0x1]]  ;;  %s1730_s30 = smov 1   ;;  %vm162_vm7 = vcmask 7168  }
   0x8   :  { %v281_v4 = vld [vmem:[%s2721_s3] sm:$0xff]  ;;  %1531 = vmatpush.msra.mxu3 %v55_v1  ;;  %v81_v8 = vld [vmem:[%s2725_s7 + $0x58] sm:$0xff]  ;;  %v80_v9 = vld [vmem:[%s2725_s7 + $0x50] sm:$0xff]  ;;  %s144_s29 = sld [smem:[#allocation2]]  ;;  %s1734_s16 = smov 125  }
   0x9   :  { %91 = vmatpush.msra.mxu0 %v84_v2  ;;  %352 = vmatpush.msra.mxu2 %v54_v3  ;;  %v82_v7 = vld [vmem:[%s2725_s7 + $0x60] sm:$0xff]  ;;  %v282_v10 = vld [vmem:[%s2721_s3 + $0x8] sm:$0xff]  ;;  %v292_v12 = vld [vmem:[%s2721_s3 + $0x58] sm:$0xff]  ;;  %s1740_s18 = smov 124   ;;  %s1741_s19 = smov 120  }
   0xa   :  { %1510 = vmatmul.msk.f32.vlgmr.msra.gmra.mxu2 %vm179_vm0, %v281_v4  ;;  %1532 = vmatpush.msra.mxu3 %v54_v3  ;;  %v79_v11 = vld [vmem:[%s2725_s7 + $0x48] sm:$0xff]  ;;  %v78_v13 = vld [vmem:[%s2725_s7 + $0x40] sm:$0xff]  ;;  %v77_v14 = vld [vmem:[%s2725_s7 + $0x38] sm:$0xff]  ;;  %s1744_s20 = smov [#allocation5]   ;;  %s1483_s23 = sshll.u32 %s2729_s11, 4  ;;  %s1484_s23 = int_to_ptr.hbm [resolvable:$true] %s1483_s23 }
   0xb   :  { %92 = vmatpush.msra.mxu0 %v83_v5  ;;  %1520 = vmatmul.msk.f32.vlgmr.msra.gmra.mxu3 %vm179_vm0, %v291_v6  ;;  %v76_v15 = vld [vmem:[%s2725_s7 + $0x30] sm:$0xff]  ;;  %v75_v17 = vld [vmem:[%s2725_s7 + $0x28] sm:$0xff]  ;;  %v293_v18 = vld [vmem:[%s2721_s3 + $0x60] sm:$0xff] }
   0xc   :  { %v283_v16 = vld [vmem:[%s2721_s3 + $0x10] sm:$0xff]  ;;  %v74_v19 = vld [vmem:[%s2725_s7 + $0x20] sm:$0xff]  ;;  %v73_v20 = vld [vmem:[%s2725_s7 + $0x18] sm:$0xff] }
   0xd   :  { %93 = vmatpush.msra.mxu0 %v82_v7  ;;  %v72_v21 = vld [vmem:[%s2725_s7 + $0x10] sm:$0xff]  ;;  %v284_v22 = vld [vmem:[%s2721_s3 + $0x18] sm:$0xff]  ;;  %v71_v23 = vld [vmem:[%s2725_s7 + $0x8] sm:$0xff] }
   0xe   :  { %v294_v24 = vld [vmem:[%s2721_s3 + $0x68] sm:$0xff]  ;;  %v70_v25 = vld [vmem:[%s2725_s7] sm:$0xff]  ;;  %v287_v30 = vld [vmem:[%s2721_s3 + $0x30] sm:$0xff] }
   0xf   :  { %94 = vmatpush.msra.mxu0 %v81_v8  ;;  %v52_v26 = vld [vmem:[%s2718_s0] sm:$0xff]  ;;  %v53_v28 = vld [vmem:[%s2718_s0 + $0x8] sm:$0xff]  ;;  %v288_v31 = vld [vmem:[%s2721_s3 + $0x38] sm:$0xff]  ;;  %s1481_s0 = sshll.u32 %s1744_s20, 4  ;;  %s1482_s0 = int_to_ptr.vmem [resolvable:$true] %s1481_s0 }
  0x10   :  { %v285_v27 = vld [vmem:[%s2721_s3 + $0x20] sm:$0xff]  ;;  %v286_v29 = vld [vmem:[%s2721_s3 + $0x28] sm:$0xff] }
  0x11   :  { %95 = vmatpush.msra.mxu0 %v80_v9  ;;  %v289_v32 = vld [vmem:[%s2721_s3 + $0x40] sm:$0xff]  ;;  %v290_v33 = vld [vmem:[%s2721_s3 + $0x48] sm:$0xff] }
  0x12   :  { %1511 = vmatmul.msk.f32.gmra.mxu2 %vm179_vm0, %v282_v10  ;;  %v1612_v40 = vld [vmem:[%s2726_s8] ss:$0 sm:$0xff] }
  0x13   :  { %96 = vmatpush.msra.mxu0 %v79_v11  ;;  %1521 = vmatmul.msk.f32.gmra.mxu3 %vm179_vm0, %v292_v12  ;;  %v1613_v4 = vld [vmem:[%s2727_s9] ss:$0 sm:$0xff] }
  0x15   :  { %97 = vmatpush.msra.mxu0 %v78_v13  ;;  %v1614_v13 = vld [vmem:[%s2727_s9 + $0x1] ss:$0 sm:$0xff] }
  0x17   :  { %98 = vmatpush.msra.mxu0 %v77_v14 }
  0x19   :  { %99 = vmatpush.msra.mxu0 %v76_v15 }
  0x1a   :  { %1512 = vmatmul.msk.f32.gmra.mxu2 %vm179_vm0, %v283_v16 }
  0x1b   :  { %100 = vmatpush.msra.mxu0 %v75_v17  ;;  %1522 = vmatmul.msk.f32.gmra.mxu3 %vm179_vm0, %v293_v18 }
  0x1d   :  { %101 = vmatpush.msra.mxu0 %v74_v19 }
  0x1f   :  { %102 = vmatpush.msra.mxu0 %v73_v20 }
  0x21   :  { %103 = vmatpush.msra.mxu0 %v72_v21 }
  0x22   :  { %1513 = vmatmul.msk.f32.gmra.mxu2 %vm179_vm0, %v284_v22 }
  0x23   :  { %104 = vmatpush.msra.mxu0 %v71_v23  ;;  %1523 = vmatmul.msk.f32.gmra.mxu3 %vm179_vm0, %v294_v24 }
  0x25   :  { %105 = vmatpush.msra.mxu0 %v70_v25 }
  0x26   :  { %106 = vmatmul.f32.vlgmr.msra.gmra.mxu0 %v52_v26 }
  0x2a   :  { %1514 = vmatmul.msk.f32.gmra.mxu2 %vm179_vm0, %v285_v27 }
  0x2e   :  { %109 = vmatmul.f32.gmra.mxu0 %v53_v28 }
  0x32   :  { %1515 = vmatmul.msk.f32.gmra.mxu2 %vm179_vm0, %v286_v29 }
  0x3a   :  { %1516 = vmatmul.msk.f32.gmra.mxu2 %vm179_vm0, %v287_v30 }
  0x42   :  { %1517 = vmatmul.msk.f32.gmra.mxu2 %vm179_vm0, %v288_v31 }
  0x4a   :  { %1518 = vmatmul.msk.f32.gmra.mxu2 %vm179_vm0, %v289_v32 }
  0x52   :  { %1519 = vmatmul.msk.f32.gmra.mxu2 %vm179_vm0, %v290_v33 }
  0x8d   :  { %v1924_v34 = vpop.f32.mrf.mxu2 }
  0x8e   :  { %2736 = vst [vmem:[#allocation8_spill] sm:$0xff] %v1924_v34  ;;  %v1926_v35 = vpop.f32.mrf.mxu3 }
  0x8f   :  { %v406_v23 = vmul.f32 %v1926_v35, %v1926_v35 }
  0x91   :  { %v441_v25 = vsel %vm410_vm1, %v406_v23, 0.0 }
  0x95   :  { %v1928_v36 = vpop.f32.mrf.mxu2 }
  0x96   :  { %2737 = vst [vmem:[#allocation9_spill] sm:$0xff] %v1928_v36  ;;  %v1930_v37 = vpop.f32.mrf.mxu3 }
  0x97   :  { %v407_v30 = vmul.f32 %v1930_v37, %v1930_v37 }
  0x99   :  { %v444_v32 = vsel %vm410_vm1, %v407_v30, 0.0 }
  0x9d   :  { %v1932_v38 = vpop.f32.mrf.mxu2 }
  0x9e   :  { %v1934_v39 = vpop.f32.mrf.mxu3 }
  0x9f   :  { %v408_v51 = vmul.f32 %v1934_v39, %v1934_v39 }
  0xa1   :  { %v447_v55 = vsel %vm410_vm1, %v408_v51, 0.0 }
  0xa3   :  { %v107_v41 = vpop.f32.mrf.mxu0 }
  0xa4   :  { %v108_v42 = vadd.f32 %v1612_v40, %v107_v41 }
  0xa5   :  { %v1939_v43 = vpop.f32.mrf.mxu2 }
  0xa6   :  { %v115_v44 = vand.u32 2147483647, %v108_v42  ;;  %v1941_v45 = vpop.f32.mrf.mxu3  ;;  %v113_v0 = vmax.f32 %v108_v42, 0.0  ;;  %v399_v33 = vmul.f32 %v1939_v43, %v1939_v43 }
  0xa7   :  { %v409_v46 = vmul.f32 %v1941_v45, %v1941_v45 }
  0xa8   :  { %v117_v47 = vsub.f32 0.0, %v115_v44  ;;  %v420_v41 = vsel %vm410_vm1, %v399_v33, 0.0 }
  0xa9   :  { %v450_v48 = vsel %vm410_vm1, %v409_v46, 0.0 }
  0xaa   :  { %v119_v49 = vmul.f32 1.442695, %v117_v47  ;;  %451 = vadd.xlane.f32.xlu2 %v450_v48  ;;  %v396_v47 = vmul.f32 %v1924_v34, %v1924_v34 }
  0xab   :  { %v110_v50 = vpop.f32.mrf.mxu0 }
  0xac   :  { %1615 = vpow2.f32 %v119_v49  ;;  %v111_v52 = vadd.f32 %v1612_v40, %v110_v50  ;;  %v411_v48 = vsel %vm410_vm1, %v396_v47, 0.0  ;;  %v397_v50 = vmul.f32 %v1928_v36, %v1928_v36 }
  0xad   :  { %v1948_v53 = vpop.f32.mrf.mxu2 }
  0xae   :  { %v116_v54 = vand.u32 2147483647, %v111_v52  ;;  %v114_v10 = vmax.f32 %v111_v52, 0.0  ;;  %v400_v42 = vmul.f32 %v1948_v53, %v1948_v53  ;;  %v414_v52 = vsel %vm410_vm1, %v397_v50, 0.0 }
  0xb0   :  { %v118_v56 = vsub.f32 0.0, %v116_v54  ;;  %v423_v46 = vsel %vm410_vm1, %v400_v42, 0.0  ;;  %v398_v54 = vmul.f32 %v1932_v38, %v1932_v38  ;;  %v145_v42 = vstv %s144_s29 }
  0xb2   :  { %v1616_v57 = vpop.eup %1615  ;;  %v121_v58 = vmul.f32 1.442695, %v118_v56  ;;  %448 = vadd.xlane.f32.xlu2 %v447_v55  ;;  %v417_v55 = vsel %vm410_vm1, %v398_v54, 0.0 }
  0xb3   :  { %v123_v59 = vadd.f32 1.0, %v1616_v57 }
  0xb4   :  { %1617 = vpow2.f32 %v121_v58 }
  0xb5   :  { %1619 = vlog2.f32 %v123_v59  ;;  %v1951_v60 = vpop.f32.mrf.mxu2 }
  0xb6   :  { %v401_v49 = vmul.f32 %v1951_v60, %v1951_v60 }
  0xb8   :  { %v426_v51 = vsel %vm410_vm1, %v401_v49, 0.0 }
  0xba   :  { %v1618_v61 = vpop.eup %1617 }
  0xbb   :  { %v1620_v62 = vpop.eup %1619  ;;  %v124_v63 = vadd.f32 1.0, %v1618_v61 }
  0xbc   :  { %v126_v1 = vmul.f32 0.6931472, %v1620_v62 }
  0xbd   :  { %1621 = vlog2.f32 %v124_v63  ;;  %v1953_v2 = vpop.f32.mrf.mxu2 }
  0xbe   :  { %v129_v3 = vadd.f32 %v126_v1, %v113_v0  ;;  %v402_v5 = vmul.f32 %v1953_v2, %v1953_v2 }
  0xc0   :  { %v1493_v6 = vadd.f32 -0.6931472, %v129_v3  ;;  %v429_v7 = vsel %vm410_vm1, %v402_v5, 0.0 }
  0xc1   :  { %430 = vadd.xlane.f32.xlu2 %v429_v7 }
  0xc2   :  { %v135_v8 = vmul.f32 %v1613_v4, %v1493_v6  ;;  %v150_v17 = vmul.f32 %v1614_v13, %v1493_v6 }
  0xc3   :  { %v1622_v9 = vpop.eup %1621 }
  0xc4   :  { %v138_v11 = vsel %vm137_vm2, %v135_v8, 0.0  ;;  %v128_v12 = vmul.f32 0.6931472, %v1622_v9  ;;  %v152_v20 = vsel %vm137_vm2, %v150_v17, 0.0 }
  0xc5   :  { %v1965_v14 = vpop.f32.mrf.mxu2  ;;  %139 = vadd.xlane.f32.xlu1 %v138_v11 }
  0xc6   :  { %v130_v15 = vadd.f32 %v128_v12, %v114_v10  ;;  %v403_v28 = vmul.f32 %v1965_v14, %v1965_v14 }
  0xc8   :  { %v1494_v16 = vadd.f32 -0.6931472, %v130_v15  ;;  %v432_v31 = vsel %vm410_vm1, %v403_v28, 0.0 }
  0xca   :  { %v136_v18 = vmul.f32 %v1613_v4, %v1494_v16  ;;  %v151_v22 = vmul.f32 %v1614_v13, %v1494_v16  ;;  %v68_v13 = vld [vmem:[%s2724_s6 + $0x60] sm:$0xff] }
  0xcc   :  { %v141_v19 = vsel %vm137_vm2, %v136_v18, 0.0  ;;  %v155_v24 = vsel %vm137_vm2, %v151_v22, 0.0 }
  0xcd   :  { %v1969_v21 = vpop.f32.mrf.mxu2  ;;  %142 = vadd.xlane.f32.xlu0 %v141_v19  ;;  %153 = vadd.xlane.f32.xlu1 %v152_v20  ;;  %v675_v20 = vsub.f32 1.0, %v68_v13 }
  0xce   :  { %v404_v40 = vmul.f32 %v1969_v21, %v1969_v21 }
  0xd0   :  { %v435_v44 = vsel %vm410_vm1, %v404_v40, 0.0 }
  0xd5   :  { %v1975_v26 = vpop.f32.mrf.mxu2  ;;  %156 = vadd.xlane.f32.xlu0 %v155_v24  ;;  %442 = vadd.xlane.f32.xlu1 %v441_v25 }
  0xd6   :  { %v405_v27 = vmul.f32 %v1975_v26, %v1975_v26 }
  0xd8   :  { %v438_v29 = vsel %vm410_vm1, %v405_v27, 0.0 }
  0xd9   :  { %439 = vadd.xlane.f32.xlu2 %v438_v29 }
  0xdd   :  { %445 = vadd.xlane.f32.xlu0 %v444_v32  ;;  %433 = vadd.xlane.f32.xlu1 %v432_v31 }
  0xe1   :  { %421 = vadd.xlane.f32.xlu2 %v420_v41  ;;  %v159_v41 = vstv %s1495_s28 }
  0xe5   :  { %436 = vadd.xlane.f32.xlu0 %v435_v44  ;;  %424 = vadd.xlane.f32.xlu1 %v423_v46 }
  0xe9   :  { %412 = vadd.xlane.f32.xlu2 %v411_v48 }
  0xed   :  { %427 = vadd.xlane.f32.xlu0 %v426_v51  ;;  %415 = vadd.xlane.f32.xlu1 %v414_v52 }
  0xf5   :  { %418 = vadd.xlane.f32.xlu0 %v417_v55 }
 0x11d   :  { %v452_v56 = vpop.xlane.xlu2 %451 }
 0x11e   :  { %1623 = vrsqrt.f32 %v452_v56  ;;  %vm616_vm5 = vcmp.eq.f32.partialorder %v452_v56, inf  ;;  %v619_v30 = vand.u32 2147483648, %v452_v56  ;;  %vm618_vm6 = vcmp.eq.f32.partialorder %v452_v56, 0.0 }
 0x124   :  { %v1624_v58 = vpop.eup %1623 }
 0x125   :  { %v449_v57 = vpop.xlane.xlu2 %448  ;;  %v610_v59 = vmul.f32 %v1624_v58, %v452_v56 }
 0x126   :  { %1625 = vrsqrt.f32 %v449_v57  ;;  %vm604_vm3 = vcmp.eq.f32.partialorder %v449_v57, inf  ;;  %v607_v8 = vand.u32 2147483648, %v449_v57  ;;  %vm606_vm4 = vcmp.eq.f32.partialorder %v449_v57, 0.0 }
 0x127   :  { %v611_v63 = vmul.f32 %v1624_v58, %v610_v59 }
 0x129   :  { %v612_v3 = vmul.f32 0.5, %v611_v63  ;;  %v69_v63 = vld [vmem:[%s2724_s6 + $0x68] sm:$0xff] }
 0x12b   :  { %v613_v7 = vsub.f32 1.5, %v612_v3 }
 0x12c   :  { %v1626_v61 = vpop.eup %1625 }
 0x12d   :  { %v598_v62 = vmul.f32 %v1626_v61, %v449_v57  ;;  %v614_v12 = vmul.f32 %v1624_v58, %v613_v7  ;;  %v676_v7 = vsub.f32 1.0, %v69_v63 }
 0x12f   :  { %v599_v0 = vmul.f32 %v1626_v61, %v598_v62  ;;  %v615_v22 = vmul.f32 %v614_v12, %v452_v56 }
 0x131   :  { %v600_v1 = vmul.f32 0.5, %v599_v0  ;;  %v617_v32 = vsel %vm616_vm5, %v452_v56, %v615_v22  ;;  %v169_v56 = vld [vmem:[%s2720_s2 + $0x20] sm:$0xff] }
 0x132   :  { %v620_v40 = vsel %vm618_vm6, %v619_v30, %v617_v32 }
 0x133   :  { %v601_v4 = vsub.f32 1.5, %v600_v1  ;;  %v634_v48 = vmul.f32 %v620_v40, %v620_v40 }
 0x134   :  { %v2007_v5 = vpop.xlane.xlu2 %430 }
 0x135   :  { %v602_v6 = vmul.f32 %v1626_v61, %v601_v4  ;;  %1627 = vrsqrt.f32 %v2007_v5  ;;  %vm532_vm8 = vcmp.eq.f32.partialorder %v2007_v5, inf  ;;  %v648_v58 = vmul.f32 %v634_v48, %v620_v40 }
 0x136   :  { %v535_v59 = vand.u32 2147483648, %v2007_v5  ;;  %vm534_vm9 = vcmp.eq.f32.partialorder %v2007_v5, 0.0 }
 0x137   :  { %v603_v9 = vmul.f32 %v602_v6, %v449_v57 }
 0x138   :  { %v140_v10 = vpop.xlane.xlu1 %139 }
 0x139   :  { %v605_v11 = vsel %vm604_vm3, %v449_v57, %v603_v9  ;;  %v146_v52 = vadd.f32 %v145_v42, %v140_v10  ;;  %v165_v57 = vld [vmem:[%s2720_s2] sm:$0xff]  ;;  %v2047_v9 = vld [vmem:[%s2724_s6 + $0x30] sm:$0xff] }
 0x13a   :  { %v608_v15 = vsel %vm606_vm4, %v607_v8, %v605_v11  ;;  %v2052_v11 = vld [vmem:[%s2724_s6 + $0x50] sm:$0xff]  ;;  %v669_v22 = vsub.f32 1.0, %v2047_v9 }
 0x13b   :  { %v1628_v16 = vpop.eup %1627  ;;  %v633_v17 = vmul.f32 %v608_v15, %v608_v15 }
 0x13c   :  { %v526_v18 = vmul.f32 %v1628_v16, %v2007_v5 }
 0x13d   :  { %v647_v19 = vmul.f32 %v633_v17, %v608_v15  ;;  %v170_v17 = vld [vmem:[%s2720_s2 + $0x28] sm:$0xff] }
 0x13e   :  { %v527_v23 = vmul.f32 %v1628_v16, %v526_v18  ;;  %v166_v18 = vld [vmem:[%s2720_s2 + $0x8] sm:$0xff] }
 0x13f   :  { %v661_v24 = vmul.f32 %v647_v19, %v68_v13  ;;  %v2066_v19 = vld [vmem:[%s2724_s6 + $0x58] sm:$0xff] }
 0x140   :  { %v528_v25 = vmul.f32 0.5, %v527_v23  ;;  %v143_v27 = vpop.xlane.xlu0 %142  ;;  %v154_v28 = vpop.xlane.xlu1 %153 }
 0x141   :  { %v689_v29 = vadd.f32 %v675_v20, %v661_v24  ;;  %v147_v44 = vadd.f32 %v145_v42, %v143_v27  ;;  %v160_v50 = vadd.f32 %v159_v41, %v154_v28 }
 0x142   :  { %v529_v31 = vsub.f32 1.5, %v528_v25  ;;  %v673_v25 = vsub.f32 1.0, %v2052_v11 }
 0x143   :  { %813 = vrot.lane.b32.xlu1 %v689_v29, %s1730_s30  ;;  %v163_v61 = vsel %vm162_vm7, %v146_v52, %v160_v50  ;;  %v674_v29 = vsub.f32 1.0, %v2066_v19 }
 0x144   :  { %v530_v33 = vmul.f32 %v1628_v16, %v529_v31 }
 0x146   :  { %v531_v49 = vmul.f32 %v530_v33, %v2007_v5 }
 0x148   :  { %v157_v46 = vpop.xlane.xlu0 %156  ;;  %v2015_v47 = vpop.xlane.xlu1 %442  ;;  %v533_v62 = vsel %vm532_vm8, %v2007_v5, %v531_v49  ;;  %v662_v5 = vmul.f32 %v648_v58, %v69_v63 }
 0x149   :  { %v161_v51 = vadd.f32 %v159_v41, %v157_v46  ;;  %1629 = vrsqrt.f32 %v2015_v47  ;;  %v536_v6 = vsel %vm534_vm9, %v535_v59, %v533_v62  ;;  %vm580_vm10 = vcmp.eq.f32.partialorder %v2015_v47, inf }
 0x14a   :  { %v627_v12 = vmul.f32 %v536_v6, %v536_v6  ;;  %v2069_v20 = vadd.f32 %v676_v7, %v662_v5  ;;  %vm582_vm11 = vcmp.eq.f32.partialorder %v2015_v47, 0.0  ;;  %v583_v28 = vand.u32 2147483648, %v2015_v47  ;;  %v2125_v5 = vld [vmem:[%s2724_s6 + $0x38] sm:$0xff] }
 0x14b   :  { %v164_v54 = vsel %vm162_vm7, %v147_v44, %v161_v51  ;;  %v2094_v51 = vld [vmem:[%s2724_s6 + $0x48] sm:$0xff] }
 0x14c   :  { %v2020_v55 = vpop.xlane.xlu2 %439  ;;  %236 = vmatpush.msrb.mxu0 %v164_v54  ;;  %1529 = vmatpush.msra.mxu1 %v164_v54  ;;  %v641_v30 = vmul.f32 %v627_v12, %v536_v6  ;;  %v2120_v6 = vld [vmem:[%s2724_s6 + $0x40] sm:$0xff] }
 0x14d   :  { %1631 = vrsqrt.f32 %v2020_v55  ;;  %vm568_vm12 = vcmp.eq.f32.partialorder %v2020_v55, inf  ;;  %vm570_vm13 = vcmp.eq.f32.partialorder %v2020_v55, 0.0  ;;  %v571_v46 = vand.u32 2147483648, %v2020_v55 }
 0x14e   :  { %237 = vmatpush.msrb.mxu0 %v163_v61  ;;  %1530 = vmatpush.msra.mxu1 %v163_v61  ;;  %v2104_v58 = vmul.f32 %v641_v30, %v2047_v9 }
 0x14f   :  { %v1630_v0 = vpop.eup %1629  ;;  %1500 = vmatmul.msk.f32.vlgmr.msra.gmra.mxu1 %vm179_vm0, %v169_v56  ;;  %1496 = vmatmul.msk.f32.vlgmr.msrb.gmra.mxu0 %vm179_vm0, %v165_v57  ;;  %v171_v56 = vld [vmem:[%s2720_s2 + $0x30] sm:$0xff] }
 0x150   :  { %v574_v1 = vmul.f32 %v1630_v0, %v2015_v47  ;;  %v2038_v3 = vpop.xlane.xlu0 %445  ;;  %v2040_v4 = vpop.xlane.xlu1 %433 }
 0x151   :  { %1633 = vrsqrt.f32 %v2038_v3  ;;  %vm592_vm14 = vcmp.eq.f32.partialorder %v2038_v3, inf  ;;  %v595_v57 = vand.u32 2147483648, %v2038_v3  ;;  %vm594_vm15 = vcmp.eq.f32.partialorder %v2038_v3, 0.0 }
 0x152   :  { %v575_v8 = vmul.f32 %v1630_v0, %v574_v1  ;;  %1635 = vrsqrt.f32 %v2040_v4  ;;  %v167_v1 = vld [vmem:[%s2720_s2 + $0x10] sm:$0xff]  ;;  %vm544_vm2 = vcmp.eq.f32.partialorder %v2040_v4, inf  ;;  %vm546_vm3 = vcmp.eq.f32.partialorder %v2040_v4, 0.0 }
 0x153   :  { %v1632_v10 = vpop.eup %1631 }
 0x154   :  { %v576_v13 = vmul.f32 0.5, %v575_v8  ;;  %v562_v15 = vmul.f32 %v1632_v10, %v2020_v55  ;;  %v2055_v16 = vpop.xlane.xlu2 %421 }
 0x155   :  { %1637 = vrsqrt.f32 %v2055_v16  ;;  %vm496_vm6 = vcmp.eq.f32.partialorder %v2055_v16, inf  ;;  %vm498_vm8 = vcmp.eq.f32.partialorder %v2055_v16, 0.0 }
 0x156   :  { %v577_v23 = vsub.f32 1.5, %v576_v13  ;;  %v563_v24 = vmul.f32 %v1632_v10, %v562_v15 }
 0x157   :  { %v1634_v27 = vpop.eup %1633  ;;  %1501 = vmatmul.msk.f32.gmra.mxu1 %vm179_vm0, %v170_v17  ;;  %1497 = vmatmul.msk.f32.gmra.mxu0 %vm179_vm0, %v166_v18 }
 0x158   :  { %v1636_v31 = vpop.eup %1635  ;;  %v578_v32 = vmul.f32 %v1630_v0, %v577_v23  ;;  %v564_v33 = vmul.f32 0.5, %v563_v24  ;;  %v586_v40 = vmul.f32 %v1634_v27, %v2038_v3  ;;  %v2080_v41 = vpop.xlane.xlu0 %436  ;;  %v671_v24 = vsub.f32 1.0, %v2120_v6 }
 0x159   :  { %v2082_v42 = vpop.xlane.xlu1 %424  ;;  %v538_v44 = vmul.f32 %v1636_v31, %v2040_v4  ;;  %1639 = vrsqrt.f32 %v2080_v41  ;;  %vm556_vm4 = vcmp.eq.f32.partialorder %v2080_v41, inf  ;;  %vm558_vm5 = vcmp.eq.f32.partialorder %v2080_v41, 0.0 }
 0x15a   :  { %v579_v48 = vmul.f32 %v578_v32, %v2015_v47  ;;  %v565_v49 = vsub.f32 1.5, %v564_v33  ;;  %v587_v50 = vmul.f32 %v1634_v27, %v586_v40  ;;  %1641 = vrsqrt.f32 %v2082_v42 }
 0x15b   :  { %v2096_v52 = vpop.eup %1637  ;;  %v539_v54 = vmul.f32 %v1636_v31, %v538_v44  ;;  %vm508_vm7 = vcmp.eq.f32.partialorder %v2082_v42, inf  ;;  %vm510_vm9 = vcmp.eq.f32.partialorder %v2082_v42, 0.0 }
 0x15c   :  { %v566_v59 = vmul.f32 %v1632_v10, %v565_v49  ;;  %v588_v61 = vmul.f32 0.5, %v587_v50  ;;  %v490_v62 = vmul.f32 %v2096_v52, %v2055_v16  ;;  %v2108_v63 = vpop.xlane.xlu2 %412  ;;  %v581_v0 = vsel %vm580_vm10, %v2015_v47, %v579_v48 }
 0x15d   :  { %v540_v7 = vmul.f32 0.5, %v539_v54  ;;  %1643 = vrsqrt.f32 %v2108_v63  ;;  %v584_v8 = vsel %vm582_vm11, %v583_v28, %v581_v0  ;;  %v672_v10 = vsub.f32 1.0, %v2094_v51 }
 0x15e   :  { %v567_v12 = vmul.f32 %v566_v59, %v2020_v55  ;;  %v589_v13 = vsub.f32 1.5, %v588_v61  ;;  %v491_v15 = vmul.f32 %v2096_v52, %v490_v62  ;;  %v631_v17 = vmul.f32 %v584_v8, %v584_v8 }
 0x15f   :  { %v1640_v18 = vpop.eup %1639  ;;  %v541_v23 = vsub.f32 1.5, %v540_v7  ;;  %1502 = vmatmul.msk.f32.gmra.mxu1 %vm179_vm0, %v171_v56  ;;  %1498 = vmatmul.msk.f32.gmra.mxu0 %vm179_vm0, %v167_v1  ;;  %v547_v47 = vand.u32 2147483648, %v2040_v4  ;;  %v670_v28 = vsub.f32 1.0, %v2125_v5  ;;  %v499_v61 = vand.u32 2147483648, %v2055_v16 }
 0x160   :  { %v1642_v30 = vpop.eup %1641  ;;  %v590_v32 = vmul.f32 %v1634_v27, %v589_v13  ;;  %v492_v33 = vmul.f32 0.5, %v491_v15  ;;  %v550_v40 = vmul.f32 %v1640_v18, %v2080_v41  ;;  %v2140_v44 = vpop.xlane.xlu0 %427  ;;  %v645_v49 = vmul.f32 %v631_v17, %v584_v8  ;;  %v172_v15 = vld [vmem:[%s2720_s2 + $0x38] sm:$0xff] }
 0x161   :  { %v2142_v48 = vpop.xlane.xlu1 %415  ;;  %v542_v50 = vmul.f32 %v1636_v31, %v541_v23  ;;  %v502_v54 = vmul.f32 %v1642_v30, %v2082_v42  ;;  %1645 = vrsqrt.f32 %v2140_v44  ;;  %v569_v56 = vsel %vm568_vm12, %v2020_v55, %v567_v12 }
 0x162   :  { %v591_v59 = vmul.f32 %v590_v32, %v2038_v3  ;;  %v551_v27 = vmul.f32 %v1640_v18, %v550_v40  ;;  %1647 = vrsqrt.f32 %v2142_v48  ;;  %v493_v31 = vsub.f32 1.5, %v492_v33  ;;  %v168_v32 = vld [vmem:[%s2720_s2 + $0x18] sm:$0xff] }
 0x163   :  { %v2153_v62 = vpop.eup %1643  ;;  %v503_v0 = vmul.f32 %v1642_v30, %v502_v54  ;;  %v659_v1 = vmul.f32 %v645_v49, %v2052_v11  ;;  %v572_v7 = vsel %vm570_vm13, %v571_v46, %v569_v56  ;;  %v543_v8 = vmul.f32 %v542_v50, %v2040_v4 }
 0x164   :  { %v552_v12 = vmul.f32 0.5, %v551_v27  ;;  %v454_v13 = vmul.f32 %v2153_v62, %v2108_v63  ;;  %v593_v17 = vsel %vm592_vm14, %v2038_v3, %v591_v59  ;;  %v630_v33 = vmul.f32 %v572_v7, %v572_v7 }
 0x165   :  { %v504_v23 = vmul.f32 0.5, %v503_v0  ;;  %v687_v55 = vadd.f32 %v673_v25, %v659_v1  ;;  %v596_v46 = vsel %vm594_vm15, %v595_v57, %v593_v17  ;;  %v494_v11 = vmul.f32 %v2096_v52, %v493_v31 }
 0x166   :  { %v553_v40 = vsub.f32 1.5, %v552_v12  ;;  %v455_v49 = vmul.f32 %v2153_v62, %v454_v13  ;;  %v632_v50 = vmul.f32 %v596_v46, %v596_v46  ;;  %v559_v3 = vand.u32 2147483648, %v2080_v41 }
 0x167   :  { %v1646_v54 = vpop.eup %1645  ;;  %v505_v25 = vsub.f32 1.5, %v504_v23  ;;  %809 = vrot.lane.b32.xlu0 %v687_v55, %s1730_s30  ;;  %1503 = vmatmul.msk.f32.gmra.mxu1 %vm179_vm0, %v172_v15  ;;  %v545_v52 = vsel %vm544_vm2, %v2040_v4, %v543_v8  ;;  %v644_v12 = vmul.f32 %v630_v33, %v572_v7  ;;  %v495_v23 = vmul.f32 %v494_v11, %v2055_v16 }
 0x168   :  { %v1648_v57 = vpop.eup %1647  ;;  %v554_v56 = vmul.f32 %v1640_v18, %v553_v40  ;;  %v514_v59 = vmul.f32 %v1646_v54, %v2140_v44  ;;  %v2184_v27 = vpop.xlane.xlu0 %418  ;;  %v646_v0 = vmul.f32 %v632_v50, %v596_v46  ;;  %1499 = vmatmul.msk.f32.gmra.mxu0 %vm179_vm0, %v168_v32  ;;  %v456_v18 = vmul.f32 0.5, %v455_v49  ;;  %v173_v32 = vld [vmem:[%s2720_s2 + $0x40] sm:$0xff] }
 0x169   :  { %v506_v31 = vmul.f32 %v1642_v30, %v505_v25  ;;  %v466_v1 = vmul.f32 %v1648_v57, %v2142_v48  ;;  %1649 = vrsqrt.f32 %v2184_v27  ;;  %v548_v30 = vsel %vm546_vm3, %v547_v47, %v545_v52 }
 0x16a   :  { %v555_v13 = vmul.f32 %v554_v56, %v2080_v41  ;;  %v515_v15 = vmul.f32 %v1646_v54, %v514_v59  ;;  %v660_v17 = vmul.f32 %v646_v0, %v2066_v19  ;;  %v658_v49 = vmul.f32 %v644_v12, %v2094_v51 }
 0x16b   :  { %v507_v55 = vmul.f32 %v506_v31, %v2082_v42  ;;  %v467_v46 = vmul.f32 %v1648_v57, %v466_v1  ;;  %v628_v47 = vmul.f32 %v548_v30, %v548_v30  ;;  %v457_v50 = vsub.f32 1.5, %v456_v18 }
 0x16c   :  { %v516_v8 = vmul.f32 0.5, %v515_v15  ;;  %v688_v7 = vadd.f32 %v674_v29, %v660_v17  ;;  %v557_v33 = vsel %vm556_vm4, %v2080_v41, %v555_v13  ;;  %v511_v11 = vand.u32 2147483648, %v2082_v42 }
 0x16d   :  { %v468_v40 = vmul.f32 0.5, %v467_v46  ;;  %v560_v4 = vsel %vm558_vm5, %v559_v3, %v557_v33  ;;  %v642_v59 = vmul.f32 %v628_v47, %v548_v30  ;;  %v509_v41 = vsel %vm508_vm7, %v2082_v42, %v507_v55  ;;  %v61_v46 = vld [vmem:[%s2724_s6 + $0x28] sm:$0xff] }
 0x16e   :  { %v517_v19 = vsub.f32 1.5, %v516_v8  ;;  %811 = vrot.lane.b32.xlu2 %v688_v7, %s1730_s30  ;;  %v629_v29 = vmul.f32 %v560_v4, %v560_v4  ;;  %v497_v3 = vsel %vm496_vm6, %v2055_v16, %v495_v23  ;;  %v512_v1 = vsel %vm510_vm9, %v511_v11, %v509_v41  ;;  %v174_v23 = vld [vmem:[%s2720_s2 + $0x48] sm:$0xff]  ;;  %v59_v41 = vld [vmem:[%s2724_s6 + $0x18] sm:$0xff] }
 0x16f   :  { %v1650_v25 = vpop.eup %1649  ;;  %v469_v56 = vsub.f32 1.5, %v468_v40  ;;  %815 = vrot.lane.b32.xlu0 %v2069_v20, %s1730_s30  ;;  %1504 = vmatmul.msk.f32.gmra.mxu1 %vm179_vm0, %v173_v32  ;;  %v686_v20 = vadd.f32 %v672_v10, %v658_v49  ;;  %v656_v13 = vmul.f32 %v642_v59, %v2125_v5  ;;  %v625_v18 = vmul.f32 %v512_v1, %v512_v1 }
 0x170   :  { %v518_v0 = vmul.f32 %v1646_v54, %v517_v19  ;;  %v478_v52 = vmul.f32 %v1650_v25, %v2184_v27  ;;  %v643_v31 = vmul.f32 %v629_v29, %v560_v4  ;;  %v458_v15 = vmul.f32 %v2153_v62, %v457_v50 }
 0x171   :  { %v470_v12 = vmul.f32 %v1648_v57, %v469_v56  ;;  %vm520_vm10 = vcmp.eq.f32.partialorder %v2140_v44, inf  ;;  %vm522_vm11 = vcmp.eq.f32.partialorder %v2140_v44, 0.0  ;;  %v523_v42 = vand.u32 2147483648, %v2140_v44 }
 0x172   :  { %v519_v17 = vmul.f32 %v518_v0, %v2140_v44  ;;  %v479_v55 = vmul.f32 %v1650_v25, %v478_v52  ;;  %v657_v54 = vmul.f32 %v643_v31, %v2120_v6  ;;  %v500_v51 = vsel %vm498_vm8, %v499_v61, %v497_v3  ;;  %v58_v52 = vld [vmem:[%s2724_s6 + $0x10] sm:$0xff] }
 0x173   :  { %v471_v10 = vmul.f32 %v470_v12, %v2142_v48  ;;  %v684_v16 = vadd.f32 %v670_v28, %v656_v13  ;;  %v639_v8 = vmul.f32 %v625_v18, %v512_v1  ;;  %v459_v7 = vmul.f32 %v458_v15, %v2108_v63  ;;  %v57_v13 = vld [vmem:[%s2724_s6 + $0x8] sm:$0xff] }
 0x174   :  { %v480_v57 = vmul.f32 0.5, %v479_v55  ;;  %v685_v62 = vadd.f32 %v671_v24, %v657_v54  ;;  %v521_v30 = vsel %vm520_vm10, %v2140_v44, %v519_v17  ;;  %v683_v6 = vadd.f32 %v669_v22, %v2104_v58  ;;  %v60_v44 = vld [vmem:[%s2724_s6 + $0x20] sm:$0xff] }
 0x175   :  { %v524_v61 = vsel %vm522_vm11, %v523_v42, %v521_v30  ;;  %v668_v5 = vsub.f32 1.0, %v61_v46  ;;  %v624_v28 = vmul.f32 %v500_v51, %v500_v51  ;;  %vm472_vm12 = vcmp.eq.f32.partialorder %v2142_v48, inf }
 0x176   :  { %v481_v32 = vsub.f32 1.5, %v480_v57  ;;  %807 = vrot.lane.b32.xlu2 %v686_v20, %s1730_s30  ;;  %805 = vrot.lane.b32.xlu1 %v685_v62, %s1730_s30  ;;  %v626_v24 = vmul.f32 %v524_v61, %v524_v61  ;;  %v475_v33 = vand.u32 2147483648, %v2142_v48  ;;  %v473_v9 = vsel %vm472_vm12, %v2142_v48, %v471_v10  ;;  %v176_v57 = vld [vmem:[%s2720_s2 + $0x58] sm:$0xff] }
 0x177   :  { %803 = vrot.lane.b32.xlu0 %v684_v16, %s1730_s30  ;;  %1505 = vmatmul.msk.f32.gmra.mxu1 %vm179_vm0, %v174_v23  ;;  %vm474_vm13 = vcmp.eq.f32.partialorder %v2142_v48, 0.0  ;;  %v653_v22 = vmul.f32 %v639_v8, %v60_v44  ;;  %v667_v58 = vsub.f32 1.0, %v60_v44  ;;  %vm460_vm14 = vcmp.eq.f32.partialorder %v2108_v63, inf  ;;  %v175_v48 = vld [vmem:[%s2720_s2 + $0x50] sm:$0xff]  ;;  %v177_v8 = vld [vmem:[%s2720_s2 + $0x60] sm:$0xff] }
 0x178   :  { %v482_v40 = vmul.f32 %v1650_v25, %v481_v32  ;;  %v640_v49 = vmul.f32 %v626_v24, %v524_v61  ;;  %v476_v4 = vsel %vm474_vm13, %v475_v33, %v473_v9  ;;  %v461_v29 = vsel %vm460_vm14, %v2108_v63, %v459_v7  ;;  %v178_v7 = vld [vmem:[%s2720_s2 + $0x68] sm:$0xff]  ;;  %s1733_s2 = smov 3  }
 0x179   :  { %v622_v19 = vmul.f32 %v476_v4, %v476_v4  ;;  %v638_v11 = vmul.f32 %v624_v28, %v500_v51  ;;  %vm484_vm15 = vcmp.eq.f32.partialorder %v2184_v27, inf  ;;  %v487_v25 = vand.u32 2147483648, %v2184_v27 }
 0x17a   :  { %v483_v47 = vmul.f32 %v482_v40, %v2184_v27  ;;  %v654_v50 = vmul.f32 %v640_v49, %v61_v46  ;;  %v463_v56 = vand.u32 2147483648, %v2108_v63  ;;  %vm486_vm2 = vcmp.eq.f32.partialorder %v2184_v27, 0.0  ;;  %v56_v46 = vld [vmem:[%s2724_s6] sm:$0xff] }
 0x17b   :  { %vm462_vm3 = vcmp.eq.f32.partialorder %v2108_v63, 0.0  ;;  %v681_v0 = vadd.f32 %v667_v58, %v653_v22  ;;  %v636_v1 = vmul.f32 %v622_v19, %v476_v4  ;;  %v666_v63 = vsub.f32 1.0, %v59_v41 }
 0x17c   :  { %v682_v59 = vadd.f32 %v668_v5, %v654_v50  ;;  %v485_v3 = vsel %vm484_vm15, %v2184_v27, %v483_v47  ;;  %v464_v12 = vsel %vm462_vm3, %v463_v56, %v461_v29  ;;  %v652_v27 = vmul.f32 %v638_v11, %v59_v41 }
 0x17d   :  { %v488_v31 = vsel %vm486_vm2, %v487_v25, %v485_v3  ;;  %v665_v15 = vsub.f32 1.0, %v58_v52  ;;  %v621_v17 = vmul.f32 %v464_v12, %v464_v12  ;;  %v650_v55 = vmul.f32 %v636_v1, %v57_v13 }
 0x17e   :  { %801 = vrot.lane.b32.xlu2 %v683_v6, %s1730_s30  ;;  %799 = vrot.lane.b32.xlu1 %v682_v59, %s1730_s30  ;;  %v623_v20 = vmul.f32 %v488_v31, %v488_v31  ;;  %v664_v54 = vsub.f32 1.0, %v57_v13  ;;  %v680_v51 = vadd.f32 %v666_v63, %v652_v27  ;;  %v663_v16 = vsub.f32 1.0, %v56_v46 }
 0x17f   :  { %797 = vrot.lane.b32.xlu0 %v681_v0, %s1730_s30  ;;  %1506 = vmatmul.msk.f32.gmra.mxu1 %vm179_vm0, %v175_v48  ;;  %v635_v62 = vmul.f32 %v621_v17, %v464_v12  ;;  %v2730_v28 = vmov 1  }
 0x180   :  { %v637_v18 = vmul.f32 %v623_v20, %v488_v31  ;;  %v678_v23 = vadd.f32 %v664_v54, %v650_v55  ;;  %1551 = vset.pattern.permute.xlu2 %v2730_v28  ;;  %1550 = vset.pattern.permute.xlu1 %v2730_v28 }
 0x181   :  { %v649_v30 = vmul.f32 %v635_v62, %v56_v46  ;;  %1549 = vset.pattern.permute.xlu0 %v2730_v28 }
 0x182   :  { %v651_v42 = vmul.f32 %v637_v18, %v58_v52 }
 0x183   :  { %v677_v61 = vadd.f32 %v663_v16, %v649_v30 }
 0x184   :  { %v679_v10 = vadd.f32 %v665_v15, %v651_v42 }
 0x186   :  { %795 = vrot.lane.b32.xlu2 %v680_v51, %s1730_s30  ;;  %793 = vrot.lane.b32.xlu1 %v679_v10, %s1730_s30 }
 0x187   :  { %791 = vrot.lane.b32.xlu0 %v678_v23, %s1730_s30  ;;  %1507 = vmatmul.msk.f32.gmra.mxu1 %vm179_vm0, %v176_v57 }
 0x18e   :  { %789 = vrot.lane.b32.xlu2 %v677_v61, %s1730_s30 }
 0x18f   :  { %1508 = vmatmul.msk.f32.gmra.mxu1 %vm179_vm0, %v177_v8 }
 0x197   :  { %1509 = vmatmul.msk.f32.gmra.mxu1 %vm179_vm0, %v178_v7 }
 0x1b5   :  { %v2334_v4 = vpop.permute.xlu1 %813 }
 0x1c8   :  { %v2311_v32 = vpop.permute.xlu2 %811 }
 0x1c9   :  { %1651 = vrcp.f32 %v2311_v32  ;;  %vm1001_vm9 = vweird.f32 %v2311_v32 }
 0x1cc   :  { %v2313_v6 = vpop.f32.mrf.mxu1  ;;  %v2319_v5 = vpop.f32.mrf.mxu0 }
 0x1cf   :  { %v2330_v9 = vpop.eup %1651 }
 0x1d0   :  { %v2315_v24 = vpop.permute.xlu2 %807  ;;  %v997_v11 = vmul.f32 %v2330_v9, %v2311_v32  ;;  %vm1002_vm10 = vweird.f32 %v2330_v9 }
 0x1d1   :  { %vm971_vm8 = vweird.f32 %v2315_v24  ;;  %v977_v8 = vand.u32 2147483648, %v2315_v24  ;;  %vm2404_vm13 = vmor %vm1001_vm9, %vm1002_vm10 }
 0x1d2   :  { %v998_v0 = vsub.f32 1.0, %v997_v11 }
 0x1d4   :  { %v2317_v44 = vpop.f32.mrf.mxu1  ;;  %v2332_v58 = vpop.f32.mrf.mxu0  ;;  %v999_v55 = vmul.f32 %v2330_v9, %v998_v0 }
 0x1d6   :  { %v1000_v30 = vadd.f32 %v2330_v9, %v999_v55 }
 0x1d8   :  { %v802_v33 = vpop.permute.xlu2 %801 }
 0x1d9   :  { %1653 = vrcp.f32 %v802_v33  ;;  %v2325_v40 = vpop.permute.xlu0 %809  ;;  %v932_v56 = vand.u32 2147483648, %v802_v33  ;;  %v930_v48 = vand.u32 2147483647, %v802_v33  ;;  %vm926_vm5 = vweird.f32 %v802_v33 }
 0x1da   :  { %1655 = vrcp.f32 %v2315_v24 }
 0x1db   :  { %v933_v1 = vor.u32 1.1754944e-38, %v932_v56  ;;  %vm931_vm7 = vcmp.eq.f32.partialorder %v930_v48, 8.507059e+37  ;;  %v975_v56 = vand.u32 2147483647, %v2315_v24 }
 0x1dc   :  { %v2328_v49 = vpop.f32.mrf.mxu1  ;;  %v2359_v15 = vpop.f32.mrf.mxu0 }
 0x1df   :  { %v1654_v22 = vpop.eup %1653 }
 0x1e0   :  { %v922_v47 = vmul.f32 %v1654_v22, %v802_v33  ;;  %v2336_v50 = vpop.permute.xlu2 %795  ;;  %v2341_v29 = vpop.eup %1655  ;;  %vm927_vm4 = vweird.f32 %v1654_v22 }
 0x1e1   :  { %1657 = vrcp.f32 %v2336_v50  ;;  %v2339_v19 = vpop.permute.xlu0 %815  ;;  %v967_v3 = vmul.f32 %v2341_v29, %v2315_v24  ;;  %vm928_vm6 = vmor %vm926_vm5, %vm927_vm4  ;;  %v887_v61 = vand.u32 2147483648, %v2336_v50  ;;  %vm972_vm11 = vweird.f32 %v2341_v29 }
 0x1e2   :  { %v923_v25 = vsub.f32 1.0, %v922_v47  ;;  %1659 = vrcp.f32 %v2334_v4  ;;  %vm881_vm14 = vweird.f32 %v2336_v50  ;;  %vm2416_vm15 = vmor %vm971_vm8, %vm972_vm11  ;;  %v1004_v24 = vsel %vm2404_vm13, %v2330_v9, %v1000_v30 }
 0x1e3   :  { %1661 = vrcp.f32 %v2325_v40  ;;  %v968_v63 = vsub.f32 1.0, %v967_v3  ;;  %vm976_vm4 = vcmp.eq.f32.partialorder %v975_v56, 8.507059e+37 }
 0x1e4   :  { %v924_v59 = vmul.f32 %v1654_v22, %v923_v25  ;;  %v2346_v41 = vpop.f32.mrf.mxu1 }
 0x1e5   :  { %v969_v23 = vmul.f32 %v2341_v29, %v968_v63  ;;  %v1005_v63 = vand.u32 2147483647, %v2311_v32 }
 0x1e6   :  { %v925_v52 = vadd.f32 %v1654_v22, %v924_v59 }
 0x1e7   :  { %v2351_v31 = vpop.eup %1657  ;;  %v970_v25 = vadd.f32 %v2341_v29, %v969_v23  ;;  %vm1006_vm5 = vcmp.eq.f32.partialorder %v1005_v63, 8.507059e+37 }
 0x1e8   :  { %v929_v12 = vsel %vm928_vm6, %v1654_v22, %v925_v52  ;;  %v877_v20 = vmul.f32 %v2351_v31, %v2336_v50  ;;  %v2355_v13 = vpop.permute.xlu1 %805  ;;  %v2361_v17 = vpop.eup %1659  ;;  %vm882_vm12 = vweird.f32 %v2351_v31  ;;  %v885_v22 = vand.u32 2147483647, %v2336_v50 }
 0x1e9   :  { %v934_v27 = vsel %vm931_vm7, %v933_v1, %v929_v12  ;;  %v2357_v18 = vpop.permute.xlu0 %803  ;;  %v2365_v51 = vpop.permute.xlu2 %789  ;;  %1663 = vrcp.f32 %v2355_v13  ;;  %v1012_v62 = vmul.f32 %v2361_v17, %v2334_v4  ;;  %v1007_v52 = vand.u32 2147483648, %v2311_v32  ;;  %vm883_vm2 = vmor %vm881_vm14, %vm882_vm12 }
 0x1ea   :  { %v935_v54 = vmul.f32 %v934_v27, %v2328_v49  ;;  %v878_v42 = vsub.f32 1.0, %v877_v20  ;;  %v2368_v10 = vpop.eup %1661  ;;  %1665 = vrcp.f32 %v2357_v18  ;;  %v2425_v20 = vpop.f32.mrf.mxu0  ;;  %v888_v50 = vor.u32 1.1754944e-38, %v887_v61 }
 0x1eb   :  { %1667 = vrcp.f32 %v2365_v51  ;;  %v982_v16 = vmul.f32 %v2368_v10, %v2325_v40  ;;  %v1013_v3 = vsub.f32 1.0, %v1012_v62  ;;  %vm886_vm3 = vcmp.eq.f32.partialorder %v885_v22, 8.507059e+37 }
 0x1ec   :  { %1073 = vperm.xlu2 %1551, %v935_v54   ;;  %v2371_v57 = vpop.f32.mrf.mxu1  ;;  %v879_v46 = vmul.f32 %v2351_v31, %v878_v42  ;;  %1669 = vrcp.f32 %v2339_v19  ;;  %v978_v42 = vor.u32 1.1754944e-38, %v977_v8  ;;  %v962_v63 = vand.u32 2147483648, %v2355_v13 }
 0x1ed   :  { %v983_v27 = vsub.f32 1.0, %v982_v16  ;;  %v2447_v16 = vmul.f32 %v2361_v17, %v1013_v3 }
 0x1ee   :  { %v880_v33 = vadd.f32 %v2351_v31, %v879_v46  ;;  %v974_v46 = vsel %vm2416_vm15, %v2341_v29, %v970_v25 }
 0x1ef   :  { %v2393_v47 = vpop.eup %1663  ;;  %v2450_v22 = vmul.f32 %v2368_v10, %v983_v27  ;;  %v979_v25 = vsel %vm976_vm4, %v978_v42, %v974_v46 }
 0x1f0   :  { %v2388_v7 = vpop.permute.xlu1 %799  ;;  %v2408_v48 = vpop.eup %1665  ;;  %v952_v12 = vmul.f32 %v2393_v47, %v2355_v13  ;;  %v884_v55 = vsel %vm883_vm2, %v2351_v31, %v880_v33  ;;  %v1008_v31 = vor.u32 1.1754944e-38, %v1007_v52  ;;  %vm957_vm9 = vweird.f32 %v2393_v47 }
 0x1f1   :  { %v2395_v11 = vpop.permute.xlu0 %797  ;;  %1671 = vrcp.f32 %v2388_v7  ;;  %v2421_v1 = vpop.eup %1667  ;;  %v937_v62 = vmul.f32 %v2408_v48, %v2357_v18  ;;  %v889_v23 = vsel %vm886_vm3, %v888_v50, %v884_v55  ;;  %v917_v55 = vand.u32 2147483648, %v2388_v7 }
 0x1f2   :  { %1673 = vrcp.f32 %v2395_v11  ;;  %v2441_v61 = vpop.eup %1669  ;;  %v832_v32 = vmul.f32 %v2421_v1, %v2365_v51  ;;  %v890_v9 = vmul.f32 %v889_v23, %v2425_v20  ;;  %v953_v8 = vsub.f32 1.0, %v952_v12 }
 0x1f3   :  { %v1009_v56 = vsel %vm1006_vm5, %v1008_v31, %v1004_v24  ;;  %v2455_v59 = vmul.f32 %v2441_v61, %v2339_v19  ;;  %v938_v0 = vsub.f32 1.0, %v937_v62  ;;  %v902_v23 = vand.u32 2147483648, %v2395_v11 }
 0x1f4   :  { %v2434_v54 = vpop.f32.mrf.mxu1  ;;  %1058 = vperm.xlu2 %1551, %v890_v9   ;;  %v833_v50 = vsub.f32 1.0, %v832_v32  ;;  %v954_v42 = vmul.f32 %v2393_v47, %v953_v8  ;;  %v900_v46 = vand.u32 2147483647, %v2395_v11  ;;  %v915_v32 = vand.u32 2147483647, %v2388_v7 }
 0x1f5   :  { %v939_v31 = vmul.f32 %v2408_v48, %v938_v0  ;;  %vm911_vm7 = vweird.f32 %v2388_v7  ;;  %vm896_vm10 = vweird.f32 %v2395_v11  ;;  %v980_v8 = vmul.f32 %v979_v25, %v2434_v54 }
 0x1f6   :  { %v903_v28 = vor.u32 1.1754944e-38, %v902_v23  ;;  %v918_v52 = vor.u32 1.1754944e-38, %v917_v55  ;;  %v955_v36 = vadd.f32 %v2393_v47, %v954_v42  ;;  %vm901_vm13 = vcmp.eq.f32.partialorder %v900_v46, 8.507059e+37 }
 0x1f7   :  { %v1672_v30 = vpop.eup %1671  ;;  %vm916_vm14 = vcmp.eq.f32.partialorder %v915_v32, 8.507059e+37  ;;  %v940_v25 = vadd.f32 %v2408_v48, %v939_v31  ;;  %vm942_vm15 = vweird.f32 %v2408_v48  ;;  %vm956_vm2 = vweird.f32 %v2355_v13 }
 0x1f8   :  { %v1674_v33 = vpop.eup %1673  ;;  %v907_v29 = vmul.f32 %v1672_v30, %v2388_v7  ;;  %vm912_vm6 = vweird.f32 %v1672_v30  ;;  %v2477_v0 = vpop.permute.xlu1 %793  ;;  %v960_v55 = vand.u32 2147483647, %v2355_v13  ;;  %vm941_vm3 = vweird.f32 %v2357_v18  ;;  %vm2489_vm4 = vmor %vm956_vm2, %vm957_vm9 }
 0x1f9   :  { %v892_v3 = vmul.f32 %v1674_v33, %v2395_v11  ;;  %v2459_v12 = vpop.permute.xlu0 %791  ;;  %vm897_vm8 = vweird.f32 %v1674_v33  ;;  %vm913_vm11 = vmor %vm911_vm7, %vm912_vm6  ;;  %vm837_vm6 = vweird.f32 %v2421_v1  ;;  %v963_v32 = vor.u32 1.1754944e-38, %v962_v63 }
 0x1fa   :  { %v908_v27 = vsub.f32 1.0, %v907_v29  ;;  %1675 = vrcp.f32 %v2459_v12  ;;  %vm898_vm12 = vmor %vm896_vm10, %vm897_vm8  ;;  %vm836_vm7 = vweird.f32 %v2365_v51  ;;  %vm961_vm8 = vcmp.eq.f32.partialorder %v960_v55, 8.507059e+37 }
 0x1fb   :  { %v893_v24 = vsub.f32 1.0, %v892_v3  ;;  %1677 = vrcp.f32 %v2477_v0  ;;  %vm2504_vm5 = vmor %vm941_vm3, %vm942_vm15  ;;  %vm1016_vm9 = vweird.f32 %v2334_v4  ;;  %v1022_v63 = vand.u32 2147483648, %v2334_v4 }
 0x1fc   :  { %v909_v62 = vmul.f32 %v1672_v30, %v908_v27  ;;  %v2467_v9 = vpop.f32.mrf.mxu1  ;;  %v834_v27 = vmul.f32 %v2421_v1, %v833_v50  ;;  %1088 = vperm.xlu2 %1551, %v980_v8   ;;  %v1028_v55 = vsub.f32 1.0, %v2455_v59  ;;  %vm986_vm2 = vweird.f32 %v2325_v40 }
 0x1fd   :  { %v894_v29 = vmul.f32 %v1674_v33, %v893_v24  ;;  %v990_v59 = vand.u32 2147483647, %v2325_v40 }
 0x1fe   :  { %v910_v3 = vadd.f32 %v1672_v30, %v909_v62  ;;  %v835_v62 = vadd.f32 %v2421_v1, %v834_v27 }
 0x1ff   :  { %v895_v34 = vadd.f32 %v1674_v33, %v894_v29 }
 0x200   :  { %v914_v7 = vsel %vm913_vm11, %v1672_v30, %v910_v3  ;;  %v2481_v50 = vpop.eup %1675  ;;  %v840_v3 = vand.u32 2147483647, %v2365_v51  ;;  %vm2522_vm11 = vmor %vm836_vm7, %vm837_vm6  ;;  %vm1032_vm7 = vweird.f32 %v2441_v61 }
 0x201   :  { %v899_v24 = vsel %vm898_vm12, %v1674_v33, %v895_v34  ;;  %v919_v11 = vsel %vm916_vm14, %v918_v52, %v914_v7  ;;  %v945_v33 = vand.u32 2147483647, %v2357_v18  ;;  %v842_v52 = vand.u32 2147483648, %v2365_v51  ;;  %v2531_v7 = vpop.eup %1677 }
 0x202   :  { %v904_v42 = vsel %vm901_vm13, %v903_v28, %v899_v24  ;;  %v920_v23 = vmul.f32 %v919_v11, %v2317_v44  ;;  %v959_v28 = vsel %vm2489_vm4, %v2393_v47, %v955_v36  ;;  %v847_v31 = vmul.f32 %v2481_v50, %v2459_v12 }
 0x203   :  { %v905_v30 = vmul.f32 %v904_v42, %v2313_v6  ;;  %v944_v36 = vsel %vm2504_vm5, %v2408_v48, %v940_v25  ;;  %v2746_v47 = vand.u32 2147483648, %v2357_v18  ;;  %v964_v27 = vsel %vm961_vm8, %v963_v32, %v959_v28 }
 0x204   :  { %v2500_v13 = vpop.f32.mrf.mxu1  ;;  %1068 = vperm.xlu1 %1550, %v920_v23   ;;  %vm946_vm10 = vcmp.eq.f32.partialorder %v945_v33, 8.507059e+37  ;;  %vm1017_vm12 = vweird.f32 %v2361_v17  ;;  %v1020_v48 = vand.u32 2147483647, %v2334_v4  ;;  %v839_v51 = vsel %vm2522_vm11, %v2421_v1, %v835_v62 }
 0x205   :  { %v1010_v29 = vmul.f32 %v1009_v56, %v2500_v13  ;;  %1063 = vperm.xlu0 %1549, %v905_v30   ;;  %v948_v8 = vor.u32 1.1754944e-38, %v2746_v47  ;;  %v843_v24 = vor.u32 1.1754944e-38, %v842_v52  ;;  %v848_v11 = vsub.f32 1.0, %v847_v31  ;;  %vm2543_vm15 = vmor %vm1016_vm9, %vm1017_vm12 }
 0x206   :  { %vm987_vm13 = vweird.f32 %v2368_v10  ;;  %v1015_v25 = vadd.f32 %v2361_v17, %v2447_v16  ;;  %v965_v42 = vmul.f32 %v964_v27, %v2371_v57  ;;  %v985_v23 = vadd.f32 %v2368_v10, %v2450_v22 }
 0x207   :  { %1098 = vperm.xlu2 %1551, %v1010_v29   ;;  %v949_v18 = vsel %vm946_vm10, %v948_v8, %v944_v36  ;;  %vm841_vm14 = vcmp.eq.f32.partialorder %v840_v3, 8.507059e+37  ;;  %v992_v34 = vand.u32 2147483648, %v2325_v40  ;;  %v862_v16 = vmul.f32 %v2531_v7, %v2477_v0  ;;  %vm988_vm3 = vmor %vm986_vm2, %vm987_vm13 }
 0x208   :  { %v950_v30 = vmul.f32 %v949_v18, %v2346_v41  ;;  %v844_v33 = vsel %vm841_vm14, %v843_v24, %v839_v51  ;;  %v849_v22 = vmul.f32 %v2481_v50, %v848_v11  ;;  %vm1021_vm4 = vcmp.eq.f32.partialorder %v1020_v48, 8.507059e+37 }
 0x209   :  { %v1023_v52 = vor.u32 1.1754944e-38, %v1022_v63  ;;  %v989_v28 = vsel %vm988_vm3, %v2368_v10, %v985_v23  ;;  %v1019_v46 = vsel %vm2543_vm15, %v2361_v17, %v1015_v25  ;;  %v845_v62 = vmul.f32 %v844_v33, %v2319_v5 }
 0x20a   :  { %v1029_v40 = vmul.f32 %v2441_v61, %v1028_v55  ;;  %v993_v32 = vor.u32 1.1754944e-38, %v992_v34  ;;  %v863_v31 = vsub.f32 1.0, %v862_v16  ;;  %vm991_vm5 = vcmp.eq.f32.partialorder %v990_v59, 8.507059e+37 }
 0x20b   :  { %v1024_v36 = vsel %vm1021_vm4, %v1023_v52, %v1019_v46  ;;  %v850_v47 = vadd.f32 %v2481_v50, %v849_v22  ;;  %vm852_vm6 = vweird.f32 %v2481_v50  ;;  %v857_v10 = vand.u32 2147483648, %v2459_v12 }
 0x20c   :  { %1083 = vperm.xlu1 %1550, %v965_v42   ;;  %v275_v4 = vpop.f32.mrf.mxu1  ;;  %v994_v29 = vsel %vm991_vm5, %v993_v32, %v989_v28  ;;  %v1030_v17 = vadd.f32 %v2441_v61, %v1029_v40  ;;  %vm851_vm8 = vweird.f32 %v2459_v12  ;;  %v1037_v27 = vand.u32 2147483648, %v2339_v19 }
 0x20d   :  { %1078 = vperm.xlu0 %1549, %v950_v30   ;;  %v995_v8 = vmul.f32 %v994_v29, %v2467_v9  ;;  %v1025_v3 = vmul.f32 %v1024_v36, %v275_v4  ;;  %v855_v63 = vand.u32 2147483647, %v2459_v12  ;;  %v864_v56 = vmul.f32 %v2531_v7, %v863_v31  ;;  %vm853_vm10 = vmor %vm851_vm8, %vm852_vm6 }
 0x20e   :  { %vm1031_vm9 = vweird.f32 %v2339_v19  ;;  %v1035_v48 = vand.u32 2147483647, %v2339_v19  ;;  %v854_v51 = vsel %vm853_vm10, %v2481_v50, %v850_v47  ;;  %v858_v24 = vor.u32 1.1754944e-38, %v857_v10 }
 0x20f   :  { %1043 = vperm.xlu2 %1551, %v845_v62   ;;  %vm2573_vm11 = vmor %vm1031_vm9, %vm1032_vm7  ;;  %v1038_v25 = vor.u32 1.1754944e-38, %v1037_v27  ;;  %vm856_vm12 = vcmp.eq.f32.partialorder %v855_v63, 8.507059e+37  ;;  %v1732_v55 = vmov 0   ;;  %v865_v42 = vadd.f32 %v2531_v7, %v864_v56 }
 0x210   :  { %v1034_v12 = vsel %vm2573_vm11, %v2441_v61, %v1030_v17  ;;  %vm1036_vm13 = vcmp.eq.f32.partialorder %v1035_v48, 8.507059e+37  ;;  %v859_v19 = vsel %vm856_vm12, %v858_v24, %v854_v51  ;;  %vm867_vm14 = vweird.f32 %v2531_v7  ;;  %v2753_v51 = vld [vmem:[#allocation9_spill] sm:$0xff] }
 0x211   :  { %v872_v23 = vand.u32 2147483648, %v2477_v0  ;;  %v1039_v50 = vsel %vm1036_vm13, %v1038_v25, %v1034_v12  ;;  %vm866_vm15 = vweird.f32 %v2477_v0  ;;  %v870_v34 = vand.u32 2147483647, %v2477_v0  ;;  %v2754_v12 = vld [vmem:[#allocation8_spill] sm:$0xff] }
 0x212   :  { %v860_v1 = vmul.f32 %v859_v19, %v2332_v58  ;;  %vm868_vm2 = vmor %vm866_vm15, %vm867_vm14  ;;  %vm1197_vm4 = vcmask 916480  }
 0x213   :  { %v869_v30 = vsel %vm868_vm2, %v2531_v7, %v865_v42  ;;  %v873_v33 = vor.u32 1.1754944e-38, %v872_v23  ;;  %vm871_vm3 = vcmp.eq.f32.partialorder %v870_v34, 8.507059e+37 }
 0x214   :  { %1093 = vperm.xlu1 %1550, %v995_v8   ;;  %v278_v11 = vpop.f32.mrf.mxu1 }
 0x215   :  { %1103 = vperm.xlu0 %1549, %v1025_v3   ;;  %v1040_v61 = vmul.f32 %v1039_v50, %v278_v11  ;;  %v874_v16 = vsel %vm871_vm3, %v873_v33, %v869_v30 }
 0x216   :  { %v875_v59 = vmul.f32 %v874_v16, %v2359_v15 }
 0x217   :  { %1554 = vset.pattern.permute.xlu2 %v1732_v55 }
 0x218   :  { %743 = vperm.xlu2 %1554, %v2467_v9  }
 0x21c   :  { %1108 = vperm.xlu1 %1550, %v1040_v61  }
 0x21d   :  { %1048 = vperm.xlu0 %1549, %v860_v1  }
 0x220   :  { %733 = vperm.xlu2 %1554, %v2371_v57  }
 0x224   :  { %1053 = vperm.xlu1 %1550, %v875_v59  }
 0x225   :  { %1553 = vset.pattern.permute.xlu0 %v1732_v55 }
 0x226   :  { %753 = vperm.xlu0 %1553, %v275_v4  }
 0x228   :  { %723 = vperm.xlu2 %1554, %v2328_v49  }
 0x22c   :  { %1552 = vset.pattern.permute.xlu1 %v1732_v55 }
 0x22d   :  { %758 = vperm.xlu1 %1552, %v278_v11  }
 0x22e   :  { %738 = vperm.xlu0 %1553, %v2434_v54  }
 0x235   :  { %748 = vperm.xlu1 %1552, %v2500_v13  }
 0x236   :  { %728 = vperm.xlu0 %1553, %v2346_v41  }
 0x23e   :  { %718 = vperm.xlu0 %1553, %v2317_v44  }
 0x246   :  { %708 = vperm.xlu0 %1553, %v2425_v20   ;;  %v1074_v57 = vpop.permute.xlu2 %1073 }
 0x247   :  { %v1117_v4 = vmul.f32 %v1074_v57, %v1953_v2 }
 0x24e   :  { %698 = vperm.xlu0 %1553, %v2332_v58   ;;  %v1059_v7 = vpop.permute.xlu2 %1058 }
 0x24f   :  { %v1114_v63 = vmul.f32 %v1059_v7, %v1939_v43 }
 0x256   :  { %v1089_v41 = vpop.permute.xlu2 %1088 }
 0x257   :  { %v1120_v58 = vmul.f32 %v1089_v41, %v1975_v26 }
 0x261   :  { %v1099_v46 = vpop.permute.xlu2 %1098 }
 0x262   :  { %v1122_v29 = vmul.f32 %v1099_v46, %v1930_v37 }
 0x269   :  { %v1044_v18 = vpop.permute.xlu2 %1043 }
 0x26a   :  { %v1111_v11 = vmul.f32 %v1044_v18, %v2754_v12 }
 0x276   :  { %v1069_v9 = vpop.permute.xlu1 %1068 }
 0x277   :  { %v1064_v0 = vpop.permute.xlu0 %1063  ;;  %v1116_v8 = vmul.f32 %v1069_v9, %v1951_v60 }
 0x278   :  { %v1115_v10 = vmul.f32 %v1064_v0, %v1948_v53 }
 0x27a   :  { %v1575_v17 = vpack.i.bf16 %v1115_v10, %v1116_v8 }
 0x27e   :  { %v1084_v49 = vpop.permute.xlu1 %1083 }
 0x27f   :  { %v1079_v22 = vpop.permute.xlu0 %1078  ;;  %v1119_v44 = vmul.f32 %v1084_v49, %v1969_v21 }
 0x280   :  { %v1118_v54 = vmul.f32 %v1079_v22, %v1965_v14 }
 0x281   :  { %v1560_v13 = vpack.i.bf16 %v1119_v44, %v1120_v58 }
 0x282   :  { %v1555_v52 = vpack.i.bf16 %v1117_v4, %v1118_v54 }
 0x284   :  { %1556 = vrot.lane.b32.xlu1 %v1555_v52, %s1733_s2 }
 0x286   :  { %v1094_v20 = vpop.permute.xlu1 %1093 }
 0x287   :  { %v1104_v28 = vpop.permute.xlu0 %1103  ;;  %v1121_v62 = vmul.f32 %v1094_v20, %v1926_v35 }
 0x288   :  { %v1123_v32 = vmul.f32 %v1104_v28, %v1934_v39 }
 0x289   :  { %v1565_v47 = vpack.i.bf16 %v1121_v62, %v1122_v29 }
 0x28c   :  { %1561 = vrot.lane.b32.xlu1 %v1560_v13, %s1733_s2 }
 0x28e   :  { %v1109_v40 = vpop.permute.xlu1 %1108 }
 0x28f   :  { %v1124_v31 = vmul.f32 %v1109_v40, %v1941_v45  ;;  %v1049_v48 = vpop.permute.xlu0 %1048 }
 0x290   :  { %v1112_v24 = vmul.f32 %v1049_v48, %v2753_v51 }
 0x291   :  { %v1570_v36 = vpack.i.bf16 %v1123_v32, %v1124_v31 }
 0x292   :  { %v1585_v25 = vpack.i.bf16 %v1111_v11, %v1112_v24 }
 0x293   :  { %1571 = vrot.lane.b32.xlu2 %v1570_v36, %s1733_s2 }
 0x294   :  { %1566 = vrot.lane.b32.xlu1 %v1565_v47, %s1733_s2 }
 0x296   :  { %v1054_v3 = vpop.permute.xlu1 %1053 }
 0x297   :  { %v1113_v27 = vmul.f32 %v1054_v3, %v1932_v38 }
 0x298   :  { %v754_v50 = vpop.permute.xlu0 %753 }
 0x299   :  { %v1580_v56 = vpack.i.bf16 %v1113_v27, %v1114_v63  ;;  %v773_v33 = vmul.f32 %v754_v50, %v1934_v39 }
 0x29b   :  { %713 = vperm.xlu2 %1554, %v2313_v6   ;;  %v744_v6 = vpop.permute.xlu2 %743 }
 0x29c   :  { %1576 = vrot.lane.b32.xlu1 %v1575_v17, %s1733_s2  ;;  %v771_v54 = vmul.f32 %v744_v6, %v1926_v35 }
 0x29f   :  { %v759_v42 = vpop.permute.xlu1 %758 }
 0x2a0   :  { %v739_v59 = vpop.permute.xlu0 %738 }
 0x2a1   :  { %v770_v44 = vmul.f32 %v739_v59, %v1975_v26 }
 0x2a3   :  { %703 = vperm.xlu2 %1554, %v2359_v15   ;;  %v734_v19 = vpop.permute.xlu2 %733  ;;  %v774_v15 = vmul.f32 %v759_v42, %v1941_v45 }
 0x2a4   :  { %1581 = vrot.lane.b32.xlu1 %v1580_v56, %s1733_s2  ;;  %v769_v13 = vmul.f32 %v734_v19, %v1969_v21 }
 0x2a7   :  { %v749_v34 = vpop.permute.xlu1 %748 }
 0x2a8   :  { %v729_v9 = vpop.permute.xlu0 %728  ;;  %v772_v49 = vmul.f32 %v749_v34, %v1930_v37 }
 0x2a9   :  { %v768_v35 = vmul.f32 %v729_v9, %v1965_v14 }
 0x2ab   :  { %693 = vperm.xlu2 %1554, %v2319_v5   ;;  %v724_v23 = vpop.permute.xlu2 %723 }
 0x2ac   :  { %1586 = vrot.lane.b32.xlu1 %v1585_v25, %s1733_s2  ;;  %v767_v32 = vmul.f32 %v724_v23, %v1953_v2 }
 0x2b0   :  { %v719_v4 = vpop.permute.xlu0 %718 }
 0x2b1   :  { %v766_v21 = vmul.f32 %v719_v4, %v1951_v60 }
 0x2b8   :  { %v709_v29 = vpop.permute.xlu0 %708 }
 0x2b9   :  { %v764_v2 = vmul.f32 %v709_v29, %v1939_v43 }
 0x2c0   :  { %v699_v18 = vpop.permute.xlu0 %698 }
 0x2c1   :  { %v762_v11 = vmul.f32 %v699_v18, %v2753_v51  ;;  %v1126_v51 = vld [vmem:[%s2722_s4 + $0x8] sm:$0xff] }
 0x2ed   :  { %v1572_v61 = vpop.permute.xlu2 %1571 }
 0x2ee   :  { %v1574_v1 = vunpack.i.h.bf16 %v1572_v61  ;;  %v1573_v30 = vunpack.i.l.bf16 %v1572_v61 }
 0x2f0   :  { %v1196_v16 = vsel %vm410_vm1, %v774_v15, %v1573_v30  ;;  %v1195_v5 = vsel %vm410_vm1, %v773_v33, %v1574_v1  ;;  %v1735_v15 = vmov 2   ;;  %v1736_v30 = vmov 0.0  }
 0x2f1   :  { %1206 = vmatpush.msrb.mxu3 %v1196_v16  ;;  %1595 = vset.pattern.permute.xlu0 %v1735_v15  ;;  %1473 = vst [vmem:[#allocation5] sm:$0xff] %v1736_v30  ;;  %v2755_v33 = vmov 1  }
 0x2f2   :  { %1597 = vset.pattern.permute.xlu1 %v1735_v15 }
 0x2f3   :  { %1207 = vmatpush.msrb.mxu3 %v1195_v5 }
 0x2f5   :  { %v714_v41 = vpop.permute.xlu2 %713 }
 0x2f6   :  { %v1557_v57 = vpop.permute.xlu1 %1556  ;;  %v765_v14 = vmul.f32 %v714_v41, %v1948_v53 }
 0x2f7   :  { %v1558_v28 = vunpack.i.l.bf16 %v1557_v57  ;;  %v1559_v62 = vunpack.i.h.bf16 %v1557_v57 }
 0x2f9   :  { %v1190_v31 = vsel %vm410_vm1, %v768_v35, %v1558_v28  ;;  %v1189_v47 = vsel %vm410_vm1, %v767_v32, %v1559_v62 }
 0x2fd   :  { %v704_v10 = vpop.permute.xlu2 %703 }
 0x2fe   :  { %v1562_v0 = vpop.permute.xlu1 %1561  ;;  %v763_v60 = vmul.f32 %v704_v10, %v1932_v38  ;;  %v1125_v38 = vld [vmem:[%s2722_s4] sm:$0xff] }
 0x2ff   :  { %v1563_v52 = vunpack.i.l.bf16 %v1562_v0  ;;  %v1564_v20 = vunpack.i.h.bf16 %v1562_v0 }
 0x301   :  { %v1192_v37 = vsel %vm410_vm1, %v770_v44, %v1563_v52  ;;  %v1191_v40 = vsel %vm410_vm1, %v769_v13, %v1564_v20  ;;  %v1737_v44 = vmov 3   ;;  %v1738_v20 = vmov 4  }
 0x302   :  { %1590 = vset.pattern.permute.xlu2 %v1737_v44 }
 0x305   :  { %v694_v53 = vpop.permute.xlu2 %693 }
 0x306   :  { %v1567_v7 = vpop.permute.xlu1 %1566  ;;  %v761_v6 = vmul.f32 %v694_v53, %v2754_v12 }
 0x307   :  { %v1569_v22 = vunpack.i.h.bf16 %v1567_v7  ;;  %v1568_v45 = vunpack.i.l.bf16 %v1567_v7 }
 0x309   :  { %v1194_v39 = vsel %vm410_vm1, %v772_v49, %v1568_v45  ;;  %v1193_v58 = vsel %vm410_vm1, %v771_v54, %v1569_v22 }
 0x30a   :  { %1208 = vmatpush.msrb.mxu3 %v1194_v39 }
 0x30c   :  { %1209 = vmatpush.msrb.mxu3 %v1193_v58  ;;  %v1739_v58 = vmov 5  }
 0x30e   :  { %v1577_v46 = vpop.permute.xlu1 %1576  ;;  %1210 = vmatpush.msrb.mxu3 %v1192_v37 }
 0x30f   :  { %v1578_v26 = vunpack.i.l.bf16 %v1577_v46  ;;  %v1579_v36 = vunpack.i.h.bf16 %v1577_v46 }
 0x310   :  { %1211 = vmatpush.msrb.mxu3 %v1191_v40 }
 0x311   :  { %v1188_v8 = vsel %vm410_vm1, %v766_v21, %v1578_v26  ;;  %v1187_v63 = vsel %vm410_vm1, %v765_v14, %v1579_v36 }
 0x312   :  { %1212 = vmatpush.msrb.mxu3 %v1190_v31 }
 0x314   :  { %1213 = vmatpush.msrb.mxu3 %v1189_v47 }
 0x316   :  { %v1582_v17 = vpop.permute.xlu1 %1581  ;;  %1214 = vmatpush.msrb.mxu3 %v1188_v8 }
 0x317   :  { %v1584_v3 = vunpack.i.h.bf16 %v1582_v17  ;;  %v1583_v27 = vunpack.i.l.bf16 %v1582_v17 }
 0x318   :  { %1215 = vmatpush.msrb.mxu3 %v1187_v63 }
 0x319   :  { %v1186_v56 = vsel %vm410_vm1, %v764_v2, %v1583_v27  ;;  %v1185_v48 = vsel %vm410_vm1, %v763_v60, %v1584_v3 }
 0x31a   :  { %1216 = vmatpush.msrb.mxu3 %v1186_v56 }
 0x31c   :  { %1217 = vmatpush.msrb.mxu3 %v1185_v48 }
 0x31e   :  { %v1587_v24 = vpop.permute.xlu1 %1586 }
 0x31f   :  { %v1589_v25 = vunpack.i.h.bf16 %v1587_v24  ;;  %v1588_v43 = vunpack.i.l.bf16 %v1587_v24 }
 0x321   :  { %v1184_v19 = vsel %vm410_vm1, %v762_v11, %v1588_v43  ;;  %v1183_v42 = vsel %vm410_vm1, %v761_v6, %v1589_v25 }
 0x322   :  { %1218 = vmatpush.msrb.mxu3 %v1184_v19 }
 0x324   :  { %1219 = vmatpush.msrb.mxu3 %v1183_v42 }
 0x325   :  { %1524 = vmatmul.msk.f32.vlgmr.msrb.gmra.mxu3 %vm1197_vm4, %v1125_v38 }
 0x32d   :  { %1525 = vmatmul.msk.f32.gmra.mxu3 %vm1197_vm4, %v1126_v51 }
 0x3a8   :  { %v2659_v23 = vpop.f32.mrf.mxu3 }
 0x3a9   :  { %v1227_v12 = vmul.f32 %v2659_v23, %v2659_v23 }
 0x3ab   :  { %1231 = vrot.lane.b32.xlu2 %v1227_v12, %s1734_s16 }
 0x3b0   :  { %v2664_v50 = vpop.f32.mrf.mxu3 }
 0x3b1   :  { %v1228_v61 = vmul.f32 %v2664_v50, %v2664_v50 }
 0x3b3   :  { %1233 = vrot.lane.b32.xlu0 %v1228_v61, %s1734_s16 }
 0x405   :  { %v1232_v34 = vpop.permute.xlu2 %1231 }
 0x406   :  { %v1237_v1 = vsel %vm410_vm1, %v1232_v34, 0.0 }
 0x407   :  { %1238 = vadd.xlane.f32.xlu0 %v1237_v1 }
 0x41b   :  { %1378 = vperm.xlu0 %1595, %v2664_v50  }
 0x423   :  { %1600 = vset.pattern.permute.xlu0 %v2755_v33 }
 0x424   :  { %1342 = vperm.xlu0 %1600, %v2659_v23  }
 0x425   :  { %v1234_v16 = vpop.permute.xlu0 %1233 }
 0x426   :  { %v1240_v5 = vsel %vm410_vm1, %v1234_v16, 0.0 }
 0x427   :  { %1241 = vadd.xlane.f32.xlu1 %v1240_v5 }
 0x42c   :  { %1611 = vset.pattern.permute.xlu0 %v1739_v58 }
 0x440   :  { %1374 = vperm.xlu1 %1597, %v2659_v23  }
 0x448   :  { %1598 = vset.pattern.permute.xlu1 %v1738_v20 }
 0x47a   :  { %v1239_v59 = vpop.xlane.xlu0 %1238 }
 0x47b   :  { %1679 = vrsqrt.f32 %v1239_v59  ;;  %vm1250_vm5 = vcmp.eq.f32.partialorder %v1239_v59, inf  ;;  %v1253_v4 = vand.u32 2147483648, %v1239_v59  ;;  %vm1252_vm6 = vcmp.eq.f32.partialorder %v1239_v59, 0.0 }
 0x481   :  { %v1680_v57 = vpop.eup %1679 }
 0x482   :  { %v1244_v9 = vmul.f32 %v1680_v57, %v1239_v59 }
 0x484   :  { %v1245_v0 = vmul.f32 %v1680_v57, %v1244_v9 }
 0x486   :  { %v1246_v7 = vmul.f32 0.5, %v1245_v0 }
 0x488   :  { %v1247_v49 = vsub.f32 1.5, %v1246_v7 }
 0x48a   :  { %v1248_v22 = vmul.f32 %v1680_v57, %v1247_v49 }
 0x48c   :  { %v1249_v45 = vmul.f32 %v1248_v22, %v1239_v59 }
 0x48e   :  { %v1251_v54 = vsel %vm1250_vm5, %v1239_v59, %v1249_v45  ;;  %vm1423_vm5 = vcmask 48128  }
 0x48f   :  { %v1254_v52 = vsel %vm1252_vm6, %v1253_v4, %v1251_v54  ;;  %vm1474_vm6 = vcmask 74752  }
 0x490   :  { %vm1267_vm7 = vcmp.lt.f32.partialorder %v1254_v52, 1e-10 }
 0x491   :  { %v1526_v39 = vsel %vm1267_vm7, 1.0, %v1736_v30 }
 0x492   :  { %v1273_v41 = vadd.f32 %v1526_v39, %v1254_v52 }
 0x494   :  { %1681 = vrcp.f32 %v1273_v41  ;;  %v1286_v35 = vand.u32 2147483648, %v1273_v41  ;;  %v1284_v40 = vand.u32 2147483647, %v1273_v41  ;;  %vm1280_vm9 = vweird.f32 %v1273_v41 }
 0x496   :  { %v1287_v31 = vor.u32 1.1754944e-38, %v1286_v35  ;;  %vm1285_vm11 = vcmp.eq.f32.partialorder %v1284_v40, 8.507059e+37 }
 0x49a   :  { %v1682_v13 = vpop.eup %1681  ;;  %v1242_v28 = vpop.xlane.xlu1 %1241 }
 0x49b   :  { %v1276_v37 = vmul.f32 %v1682_v13, %v1273_v41  ;;  %1683 = vrsqrt.f32 %v1242_v28  ;;  %vm1281_vm8 = vweird.f32 %v1682_v13  ;;  %vm1262_vm12 = vcmp.eq.f32.partialorder %v1242_v28, inf }
 0x49c   :  { %vm1282_vm10 = vmor %vm1280_vm9, %vm1281_vm8  ;;  %v1265_v3 = vand.u32 2147483648, %v1242_v28  ;;  %vm1264_vm13 = vcmp.eq.f32.partialorder %v1242_v28, 0.0 }
 0x49d   :  { %v1277_v46 = vsub.f32 1.0, %v1276_v37 }
 0x49f   :  { %v1278_v62 = vmul.f32 %v1682_v13, %v1277_v46 }
 0x4a1   :  { %v1684_v32 = vpop.eup %1683  ;;  %v1279_v26 = vadd.f32 %v1682_v13, %v1278_v62 }
 0x4a2   :  { %v1256_v29 = vmul.f32 %v1684_v32, %v1242_v28 }
 0x4a3   :  { %v1283_v21 = vsel %vm1282_vm10, %v1682_v13, %v1279_v26 }
 0x4a4   :  { %v1288_v36 = vsel %vm1285_vm11, %v1287_v31, %v1283_v21  ;;  %v1257_v47 = vmul.f32 %v1684_v32, %v1256_v29 }
 0x4a5   :  { %v2679_v10 = vmul.f32 %v1288_v36, %v2659_v23 }
 0x4a6   :  { %v1258_v14 = vmul.f32 0.5, %v1257_v47 }
 0x4a7   :  { %1319 = vperm.xlu2 %1590, %v2679_v10  }
 0x4a8   :  { %v1259_v8 = vsub.f32 1.5, %v1258_v14 }
 0x4aa   :  { %v1260_v17 = vmul.f32 %v1684_v32, %v1259_v8 }
 0x4ac   :  { %v1261_v2 = vmul.f32 %v1260_v17, %v1242_v28 }
 0x4ae   :  { %v1263_v27 = vsel %vm1262_vm12, %v1242_v28, %v1261_v2 }
 0x4af   :  { %v1266_v63 = vsel %vm1264_vm13, %v1265_v3, %v1263_v27  ;;  %1591 = vset.pattern.permute.xlu2 %v1739_v58 }
 0x4b0   :  { %vm1268_vm14 = vcmp.lt.f32.partialorder %v1266_v63, 1e-10  ;;  %1384 = vperm.xlu2 %1591, %v2679_v10  }
 0x4b1   :  { %v1527_v60 = vsel %vm1268_vm14, 1.0, %v1736_v30 }
 0x4b2   :  { %v1274_v56 = vadd.f32 %v1527_v60, %v1266_v63  ;;  %v1375_v30 = vpop.permute.xlu1 %1374 }
 0x4b4   :  { %1685 = vrcp.f32 %v1274_v56  ;;  %v1301_v24 = vand.u32 2147483648, %v1274_v56  ;;  %v1299_v25 = vand.u32 2147483647, %v1274_v56  ;;  %vm1295_vm2 = vweird.f32 %v1274_v56 }
 0x4b6   :  { %v1302_v6 = vor.u32 1.1754944e-38, %v1301_v24  ;;  %vm1300_vm4 = vcmp.eq.f32.partialorder %v1299_v25, 8.507059e+37  ;;  %v1742_v24 = vmov 3.0  }
 0x4b7   :  { %1687 = vrcp.f32 %v1742_v24 }
 0x4b8   :  { %1592 = vset.pattern.permute.xlu2 %v1737_v44  ;;  %v1379_v44 = vpop.permute.xlu0 %1378 }
 0x4ba   :  { %v1686_v48 = vpop.eup %1685 }
 0x4bb   :  { %v1291_v18 = vmul.f32 %v1686_v48, %v1274_v56  ;;  %vm1296_vm15 = vweird.f32 %v1686_v48 }
 0x4bc   :  { %vm1297_vm3 = vmor %vm1295_vm2, %vm1296_vm15 }
 0x4bd   :  { %v1292_v53 = vsub.f32 1.0, %v1291_v18 }
 0x4bf   :  { %v1293_v11 = vmul.f32 %v1686_v48, %v1292_v53 }
 0x4c0   :  { %v1343_v31 = vpop.permute.xlu0 %1342 }
 0x4c1   :  { %v1294_v43 = vadd.f32 %v1686_v48, %v1293_v11  ;;  %v1349_v21 = vmul.f32 %v1343_v31, %v2679_v10  ;;  %v1688_v11 = vpop.eup %1687 }
 0x4c2   :  { %v1460_v25 = vmul.f32 3.0, %v1688_v11 }
 0x4c3   :  { %v1298_v19 = vsel %vm1297_vm3, %v1686_v48, %v1294_v43 }
 0x4c4   :  { %v1303_v38 = vsel %vm1300_vm4, %v1302_v6, %v1298_v19  ;;  %v1461_v43 = vsub.f32 1.0, %v1460_v25 }
 0x4c5   :  { %v1304_v42 = vmul.f32 %v1303_v38, %v2664_v50 }
 0x4c6   :  { %v1462_v6 = vmul.f32 %v1688_v11, %v1461_v43 }
 0x4c7   :  { %1356 = vperm.xlu1 %1598, %v1304_v42   ;;  %1324 = vperm.xlu2 %1592, %v1304_v42  }
 0x4c8   :  { %v1463_v19 = vadd.f32 %v1688_v11, %v1462_v6 }
 0x4cf   :  { %1593 = vset.pattern.permute.xlu2 %v1739_v58  ;;  %1599 = vset.pattern.permute.xlu1 %v2755_v33  ;;  %v1381_v58 = vmul.f32 %v1375_v30, %v2679_v10 }
 0x4d0   :  { %1388 = vperm.xlu2 %1593, %v1304_v42  }
 0x4d8   :  { %1594 = vset.pattern.permute.xlu2 %v1732_v55 }
 0x4d9   :  { %1312 = vperm.xlu2 %1594, %v2664_v50  }
 0x4e1   :  { %1307 = vperm.xlu2 %1594, %v2659_v23  }
 0x4e9   :  { %1596 = vset.pattern.permute.xlu2 %v1738_v20  ;;  %v1382_v20 = vmul.f32 %v1379_v44, %v1304_v42 }
 0x4ea   :  { %1352 = vperm.xlu2 %1596, %v2679_v10  }
 0x501   :  { %v1320_v51 = vpop.permute.xlu2 %1319 }
 0x502   :  { %v1327_v12 = vmul.f32 %v1320_v51, %v2659_v23 }
 0x504   :  { %1331 = vrot.lane.b32.xlu1 %v1327_v12, %s1733_s2 }
 0x50a   :  { %v1385_v61 = vpop.permute.xlu2 %1384 }
 0x50b   :  { %v1391_v33 = vmul.f32 %v1385_v61, %v2659_v23 }
 0x50c   :  { %1346 = vperm.xlu1 %1599, %v2664_v50  }
 0x521   :  { %v1325_v15 = vpop.permute.xlu2 %1324 }
 0x522   :  { %v1328_v34 = vmul.f32 %v1325_v15, %v2664_v50 }
 0x524   :  { %1333 = vrot.lane.b32.xlu2 %v1328_v34, %s1733_s2 }
 0x52a   :  { %v1389_v55 = vpop.permute.xlu2 %1388 }
 0x52b   :  { %v1392_v1 = vmul.f32 %v1389_v55, %v2664_v50 }
 0x52d   :  { %1397 = vrot.lane.b32.xlu2 %v1392_v1, %s1733_s2 }
 0x533   :  { %v1313_v16 = vpop.permute.xlu2 %1312 }
 0x534   :  { %v1316_v22 = vmul.f32 %v1313_v16, %v1304_v42 }
 0x535   :  { %1395 = vrot.lane.b32.xlu2 %v1391_v33, %s1733_s2 }
 0x539   :  { %v1357_v5 = vpop.permute.xlu1 %1356 }
 0x53a   :  { %v1360_v59 = vmul.f32 %v1357_v5, %v2664_v50 }
 0x53b   :  { %v1308_v57 = vpop.permute.xlu2 %1307 }
 0x53c   :  { %v1315_v49 = vmul.f32 %v1308_v57, %v2679_v10  ;;  %v1426_v10 = vld [vmem:[%s2723_s5] sm:$0x3]  ;;  %s1743_s5 = smov 9  }
 0x53d   :  { %1365 = vrot.lane.b32.xlu2 %v1360_v59, %s1733_s2 }
 0x544   :  { %v1353_v9 = vpop.permute.xlu2 %1352 }
 0x545   :  { %v1359_v0 = vmul.f32 %v1353_v9, %v2659_v23 }
 0x547   :  { %1363 = vrot.lane.b32.xlu1 %v1359_v0, %s1733_s2 }
 0x576   :  { %v1332_v7 = vpop.permute.xlu1 %1331 }
 0x577   :  { %v1337_v45 = vadd.f32 %v1332_v7, %v1315_v49 }
 0x579   :  { %v1339_v52 = vmul.f32 0.5, %v1337_v45 }
 0x57e   :  { %v1334_v4 = vpop.permute.xlu2 %1333  ;;  %v1347_v62 = vpop.permute.xlu1 %1346 }
 0x57f   :  { %v1338_v54 = vadd.f32 %v1334_v4, %v1316_v22  ;;  %v1350_v26 = vmul.f32 %v1347_v62, %v1304_v42 }
 0x581   :  { %v1340_v39 = vmul.f32 0.5, %v1338_v54 }
 0x583   :  { %v1601_v41 = vpack.i.bf16 %v1339_v52, %v1340_v39 }
 0x585   :  { %1602 = vrot.lane.b32.xlu2 %v1601_v41, %s1734_s16 }
 0x587   :  { %v1398_v50 = vpop.permute.xlu2 %1397 }
 0x588   :  { %v1402_v23 = vadd.f32 %v1398_v50, %v1382_v20 }
 0x58a   :  { %v1404_v37 = vmul.f32 0.5, %v1402_v23 }
 0x58f   :  { %v1396_v13 = vpop.permute.xlu2 %1395 }
 0x590   :  { %v1401_v28 = vadd.f32 %v1396_v13, %v1381_v58 }
 0x592   :  { %v1403_v46 = vmul.f32 0.5, %v1401_v28 }
 0x594   :  { %v1606_v35 = vpack.i.bf16 %v1403_v46, %v1404_v37 }
 0x596   :  { %1607 = vrot.lane.b32.xlu1 %v1606_v35, %s1733_s2 }
 0x597   :  { %v1366_v40 = vpop.permute.xlu2 %1365 }
 0x598   :  { %v1370_v36 = vadd.f32 %v1366_v40, %v1350_v26 }
 0x59a   :  { %v1372_v8 = vmul.f32 0.5, %v1370_v36 }
 0x5b9   :  { %v1364_v32 = vpop.permute.xlu1 %1363 }
 0x5ba   :  { %v1369_v47 = vadd.f32 %v1364_v32, %v1349_v21 }
 0x5bc   :  { %v1371_v63 = vmul.f32 0.5, %v1369_v47 }
 0x5df   :  { %v1603_v29 = vpop.permute.xlu2 %1602 }
 0x5e0   :  { %v1604_v14 = vunpack.i.l.bf16 %v1603_v29  ;;  %v1605_v17 = vunpack.i.h.bf16 %v1603_v29 }
 0x5e2   :  { %v1422_v60 = vsel %vm410_vm1, %v1604_v14, %v1372_v8  ;;  %v1421_v48 = vsel %vm410_vm1, %v1605_v17, %v1371_v63  ;;  %vm1464_vm1 = vweird.f32 %v1688_v11 }
 0x5e3   :  { %v1465_v12 = vsel %vm1464_vm1, %v1688_v11, %v1463_v19 }
 0x608   :  { %v1608_v2 = vpop.permute.xlu1 %1607 }
 0x609   :  { %v1610_v3 = vunpack.i.h.bf16 %v1608_v2  ;;  %v1609_v27 = vunpack.i.l.bf16 %v1608_v2 }
 0x60b   :  { %v1425_v56 = vsel %vm1423_vm5, %v1422_v60, %v1609_v27  ;;  %v1424_v18 = vsel %vm1423_vm5, %v1421_v48, %v1610_v3 }
 0x60c   :  { %1444 = vmatpush.msra.mxu3 %v1425_v56 }
 0x60e   :  { %1445 = vmatpush.msra.mxu3 %v1424_v18 }
 0x60f   :  { %1528 = vmatmul.msk.f32.vlgmr.msra.gmra.mxu3 %vm179_vm0, %v1426_v10  ;;  %vm1471_vm0 = vcmask 72704  }
 0x692   :  { %v1447_v53 = vpop.f32.mrf.mxu3 }
 0x693   :  { %1451 = vrot.lane.b32.xlu0 %v1447_v53, %s1740_s18  ;;  %1455 = vrot.lane.b32.xlu2 %v1447_v53, %s1741_s19 }
 0x6ed   :  { %v1456_v51 = vpop.permute.xlu2 %1455 }
 0x705   :  { %v1452_v38 = vpop.permute.xlu0 %1451 }
 0x706   :  { %v1454_v42 = vadd.f32 %v1452_v38, %v1447_v53 }
 0x708   :  { %v1458_v61 = vadd.f32 %v1456_v51, %v1454_v42 }
 0x70a   :  { %v1466_v15 = vmul.f32 %v1465_v12, %v1458_v61 }
 0x70c   :  { %1468 = vrot.lane.b32.xlu1 %v1466_v15, %s1743_s5 }
 0x77e   :  { %v1469_v34 = vpop.permute.xlu1 %1468 }
 0x77f   :  { %v1472_v55 = vsel %vm1471_vm0, %v1447_v53, %v1469_v34 }
 0x780   :  { %1475 = vst.msk [vmem:[#allocation5] sm:$0x3] %vm1474_vm6, %v1472_v55 }
 0x781   :  { %1486 = dma.vmem_to_hbm [thread:$0]  %s1482_s0, 128, %s1484_s23, [#allocation3]  }
 0x782   :  { %1727 = dma.done.wait [#allocation3], 128  }
 0x783   :  { %1728 = vsyncadd [#allocation3], 4294967168 }
 0x784   :  { %1491 = vsyncpa [#allocation3], 1 }
 0x785   :  { %1492 = vsyncpa [#allocation4], 1 }

</bundles_post_ra>
